<compile_context>
chip_gen: v6e
topology: v6e:2x2x1
jax: 0.10.0
libtpu: 0.0.40
codegen_flags: <defaults>
</compile_context>

<pallas_src>
import jax
import jax.numpy as jnp
import numpy as np
from jax import lax
from jax.experimental import pallas as pl
from jax.experimental.pallas import tpu as pltpu

EPS = 1e-5
LANE = 128
F32 = jnp.float32
BF16 = jnp.bfloat16


def _round_up(x, m):
    return ((x + m - 1) // m) * m


def _pick_images_per_step(n, mb, max_rows=2048):
    """Largest divisor of n such that ib * (rows per image) <= max_rows."""
    ib = 1
    for d in range(1, n + 1):
        if n % d == 0 and d * mb <= max_rows:
            ib = d
    return ib


# ---------------------------------------------------------------------------
# PreActBlock forward.
#   x     : (N, Cin, H, W)         f32 NCHW (PyTorch layout)
#   w1    : (planes, Cin, 3, 3)    conv1 weight (OIHW)
#   gamma : (planes,)              bn2 weight
#   beta  : (planes,)              bn2 bias
#   w2    : (planes, planes, 3, 3) conv2 weight (OIHW)
#   wsc   : (planes, Cin, 1, 1)    1x1 projection shortcut weight, or None
# ---------------------------------------------------------------------------
def preact_block_forward(x, w1, gamma, beta, w2, wsc=None, stride=1):
    assert stride in (1, 2)  # TODO(synk): generalize phase split to stride > 2
    n, cin, h, w = x.shape
    planes = w1.shape[0]
    has_proj = (stride != 1) or (cin != planes)
    assert has_proj == (wsc is not None)

    ci = _round_up(cin, LANE)          # padded input channels  (lane-dense K)
    cp = _round_up(planes, LANE)       # padded output channels (lane-dense N)
    ho = (h - 1) // stride + 1
    wo = (w - 1) // stride + 1
    mb = ho * wo                       # output rows per image
    ib = _pick_images_per_step(n, mb)  # images per grid step
    G = n // ib                        # grid size
    mbt = ib * mb                      # matmul M per grid step
    mtot = n * mb                      # total BN sample count per channel

    # ----- wrapper-side layout glue: relu + transpose + pads + bf16, fused ---
    xr = jnp.maximum(jnp.transpose(x, (0, 2, 3, 1)).astype(F32), 0.0)   # NHWC
    xr = jnp.pad(xr, ((0, 0), (0, 0), (0, 0), (0, ci - cin)))           # lane pad

    if stride == 1:
        # Plain halo pad: (n, h+2, w+2, ci) bf16.
        conv1_in = jnp.pad(xr, ((0, 0), (1, 1), (1, 1), (0, 0))).astype(BF16)
        conv1_block = (ib, h + 2, w + 2, ci)
        conv1_idx = lambda g: (g, 0, 0, 0)
    else:
        # Space-to-depth phase split so every in-kernel tap slice is unit-stride.
        hp2, wp2 = 2 * (ho + 1), 2 * (wo + 1)
        xp = jnp.pad(xr, ((0, 0), (1, hp2 - 1 - h), (1, wp2 - 1 - w), (0, 0)))
        xp = xp.astype(BF16)
        # phases[:, p*2+q, a, b, :] == padded[:, 2a+p, 2b+q, :]
        conv1_in = (xp.reshape(n, ho + 1, 2, wo + 1, 2, ci)
                      .transpose(0, 2, 4, 1, 3, 5)
                      .reshape(n, 4, ho + 1, wo + 1, ci))
        conv1_block = (ib, 4, ho + 1, wo + 1, ci)
        conv1_idx = lambda g: (g, 0, 0, 0, 0)

    # Weights -> tap-major [9, K, N] (flattened HWIO), channel padded, bf16.
    w1_m = jnp.pad(jnp.transpose(w1, (2, 3, 1, 0)).reshape(9, cin, planes),
                   ((0, 0), (0, ci - cin), (0, cp - planes))).astype(BF16)
    w2_m = jnp.pad(jnp.transpose(w2, (2, 3, 1, 0)).reshape(9, planes, planes),
                   ((0, 0), (0, cp - planes), (0, cp - planes))).astype(BF16)
    gamma_p = jnp.pad(gamma.astype(F32), (0, cp - planes)).reshape(1, cp)
    beta_p = jnp.pad(beta.astype(F32), (0, cp - planes)).reshape(1, cp)

    cparams = pltpu.CompilerParams(
        dimension_semantics=("parallel",),            # megacore-shard grid axis
        vmem_limit_bytes=48 * 1024 * 1024)            # headroom under v7x 64MiB

    # ===================== Kernel 1: relu(x) -> conv1 =======================
    # Value accumulation over the 9 taps (no accumulator VMEM round trips);
    # emits bf16 conv1 output plus exact per-tile BN partial stats in f32.
    def conv1_kernel(x_ref, w_ref, o1_ref, sum_ref, m2_ref):
        acc = None
        for di in range(3):
            for dj in range(3):
                if stride == 1:
                    tap = x_ref[:, pl.ds(di, ho), pl.ds(dj, wo), :]
                else:
                    ph = (di % 2) * 2 + (dj % 2)
                    tap = x_ref[:, pl.ds(ph, 1),
                                pl.ds(di // 2, ho), pl.ds(dj // 2, wo), :]
                t = tap.reshape(mbt, ci)                       # bf16, relu'd
                wt = w_ref[pl.ds(di * 3 + dj, 1)].reshape(ci, cp)
                d = jnp.dot(t, wt, preferred_element_type=F32)
                acc = d if acc is None else acc + d
        s = jnp.sum(acc, axis=0, keepdims=True)                # per-tile sum
        mu = s * (1.0 / mbt)
        m2 = jnp.sum((acc - mu) ** 2, axis=0, keepdims=True)   # per-tile M2
        o1_ref[...] = acc.astype(BF16).reshape(ib, ho, wo, cp)
        sum_ref[...] = s.reshape(1, 1, cp)
        m2_ref[...] = m2.reshape(1, 1, cp)

    o1, sums, m2s = pl.pallas_call(
        conv1_kernel,
        grid=(G,),
        in_specs=[pl.BlockSpec(conv1_block, conv1_idx),
                  pl.BlockSpec((9, ci, cp), lambda g: (0, 0, 0))],
        out_specs=[pl.BlockSpec((ib, ho, wo, cp), lambda g: (g, 0, 0, 0)),
                   pl.BlockSpec((1, 1, cp), lambda g: (g, 0, 0)),
                   pl.BlockSpec((1, 1, cp), lambda g: (g, 0, 0))],
        out_shape=[jax.ShapeDtypeStruct((n, ho, wo, cp), BF16),
                   jax.ShapeDtypeStruct((G, 1, cp), F32),
                   jax.ShapeDtypeStruct((G, 1, cp), F32)],
        compiler_params=cparams,
    )(conv1_in, w1_m)

    # ----- exact global BN statistics (Chan parallel-variance combine) ------
    mean = jnp.sum(sums, axis=0) / mtot                              # (1, cp)
    mean_g = sums / mbt                                              # (G, 1, cp)
    var = (jnp.sum(m2s, axis=0)
           + mbt * jnp.sum((mean_g - mean) ** 2, axis=0)) / mtot     # (1, cp)
    scale = gamma_p * lax.rsqrt(var + EPS)                           # fold affine
    bias = beta_p - mean * scale

    # ========== Kernel 2: bn2 -> relu -> conv2 (+ shortcut add) =============
    wq = wo + 2                                    # halo'd scratch width

    def make_conv2_kernel(proj):
        def kernel(o1_ref, sc_ref, scale_ref, bias_ref, w_ref, *rest):
            if proj:
                wsc_ref, out_ref, hpad_ref = rest
            else:
                out_ref, hpad_ref = rest
            # BN (pre-folded scale/bias) + ReLU in f32, stored bf16 into the
            # halo'd scratch interior (one pass, one store).
            hh = (o1_ref[...].reshape(mbt, cp).astype(F32) * scale_ref[...]
                  + bias_ref[...])
            hh = jnp.maximum(hh, 0.0).astype(BF16)
            hpad_ref[:, pl.ds(1, ho), pl.ds(1, wo), :] = hh.reshape(ib, ho, wo, cp)
            # Re-zero only the thin halo border each step (megacore-safe: every
            # core fully defines its own scratch every iteration).
            hpad_ref[:, pl.ds(0, 1), :, :] = jnp.zeros((ib, 1, wq, cp), BF16)
            hpad_ref[:, pl.ds(ho + 1, 1), :, :] = jnp.zeros((ib, 1, wq, cp), BF16)
            hpad_ref[:, pl.ds(1, ho), pl.ds(0, 1), :] = jnp.zeros((ib, ho, 1, cp), BF16)
            hpad_ref[:, pl.ds(1, ho), pl.ds(wo + 1, 1), :] = jnp.zeros((ib, ho, 1, cp), BF16)
            # Shortcut term initializes the value accumulator.
            if proj:
                sc = sc_ref[...].reshape(mbt, ci)              # relu(x), bf16
                acc = jnp.dot(sc, wsc_ref[...], preferred_element_type=F32)
            else:
                acc = sc_ref[...].reshape(mbt, cp)             # raw x, f32
            # conv2: 9 taps from the halo'd bf16 activation scratch.
            for di in range(3):
                for dj in range(3):
                    tap = hpad_ref[:, pl.ds(di, ho), pl.ds(dj, wo), :]
                    wt = w_ref[pl.ds(di * 3 + dj, 1)].reshape(cp, cp)
                    acc = acc + jnp.dot(tap.reshape(mbt, cp), wt,
                                        preferred_element_type=F32)
            out_ref[...] = acc.reshape(ib, ho, wo, cp)
        return kernel

    scratch2 = [pltpu.VMEM((ib, ho + 2, wq, cp), BF16)]   # halo'd relu(bn(o1))
    out_spec = pl.BlockSpec((ib, ho, wo, cp), lambda g: (g, 0, 0, 0))
    out_shape = jax.ShapeDtypeStruct((n, ho, wo, cp), F32)

    if has_proj:
        if stride == 1:
            sc_in = xr.astype(BF16)                       # relu(x), (n,h,w,ci)
        else:
            # Strided relu(x) = phase (1,1) of the space-to-depth split.
            sc_in = conv1_in[:, 3, :ho, :wo, :]           # (n, ho, wo, ci) bf16
        wsc_m = jnp.pad(jnp.transpose(wsc, (2, 3, 1, 0)).reshape(cin, planes),
                        ((0, ci - cin), (0, cp - planes))).astype(BF16)
        in_specs = [pl.BlockSpec((ib, ho, wo, cp), lambda g: (g, 0, 0, 0)),  # o1
                    pl.BlockSpec((ib, ho, wo, ci), lambda g: (g, 0, 0, 0)),  # sc
                    pl.BlockSpec((1, cp), lambda g: (0, 0)),                 # scale
                    pl.BlockSpec((1, cp), lambda g: (0, 0)),                 # bias
                    pl.BlockSpec((9, cp, cp), lambda g: (0, 0, 0)),          # w2
                    pl.BlockSpec((ci, cp), lambda g: (0, 0))]                # wsc
        args = (o1, sc_in, scale, bias, w2_m, wsc_m)
        kern = make_conv2_kernel(True)
    else:
        # Identity shortcut: add raw x (kept f32 for exactness of the residual).
        sc_in = jnp.pad(jnp.transpose(x, (0, 2, 3, 1)).astype(F32),
                        ((0, 0), (0, 0), (0, 0), (0, cp - cin)))
        in_specs = [pl.BlockSpec((ib, ho, wo, cp), lambda g: (g, 0, 0, 0)),  # o1
                    pl.BlockSpec((ib, ho, wo, cp), lambda g: (g, 0, 0, 0)),  # x
                    pl.BlockSpec((1, cp), lambda g: (0, 0)),                 # scale
                    pl.BlockSpec((1, cp), lambda g: (0, 0)),                 # bias
                    pl.BlockSpec((9, cp, cp), lambda g: (0, 0, 0))]          # w2
        args = (o1, sc_in, scale, bias, w2_m)
        kern = make_conv2_kernel(False)

    out_full = pl.pallas_call(
        kern, grid=(G,),
        in_specs=in_specs, out_specs=out_spec, out_shape=out_shape,
        scratch_shapes=scratch2, compiler_params=cparams,
    )(*args)

    out = out_full[..., :planes]                      # drop channel padding
    return jnp.transpose(out, (0, 3, 1, 2))           # NHWC -> NCHW


# ---------------------------------------------------------------------------
# Pure-JAX reference (mirrors the PyTorch forward exactly, NCHW / OIHW, f32).
# ---------------------------------------------------------------------------
def ref_forward(x, w1, gamma, beta, w2, wsc, stride):
    dn = ('NCHW', 'OIHW', 'NCHW')
    out = jax.nn.relu(x)
    if wsc is not None:
        shortcut = lax.conv_general_dilated(out, wsc, (stride, stride), 'VALID',
                                            dimension_numbers=dn)
    else:
        shortcut = x
    o1 = lax.conv_general_dilated(out, w1, (stride, stride), ((1, 1), (1, 1)),
                                  dimension_numbers=dn)
    mean = o1.mean(axis=(0, 2, 3), keepdims=True)
    var = ((o1 - mean) ** 2).mean(axis=(0, 2, 3), keepdims=True)
    g = gamma.reshape(1, -1, 1, 1)
    b = beta.reshape(1, -1, 1, 1)
    hact = jax.nn.relu(g * (o1 - mean) / jnp.sqrt(var + EPS) + b)
    o2 = lax.conv_general_dilated(hact, w2, (1, 1), ((1, 1), (1, 1)),
                                  dimension_numbers=dn)
    return o2 + shortcut


if __name__ == "__main__":
    key = jax.random.PRNGKey(0)
    k = jax.random.split(key, 8)

    # Tolerances: activations are stored/fed to the MXU in bf16 (per the perf
    # review), so a few-percent deviation from the pure-f32 reference is the
    # expected bf16 rounding, not a semantics error.
    RTOL, ATOL = 2e-2, 4e-2

    # --- Config A: projection shortcut (stride=2, in_planes != planes) ---
    n, cin, planes, hsp, wsp, stride = 2, 4, 8, 16, 16, 2
    x = jax.random.normal(k[0], (n, cin, hsp, wsp), jnp.float32)
    w1 = jax.random.normal(k[1], (planes, cin, 3, 3), jnp.float32) * 0.1
    w2 = jax.random.normal(k[2], (planes, planes, 3, 3), jnp.float32) * 0.1
    wsc = jax.random.normal(k[3], (planes, cin, 1, 1), jnp.float32) * 0.1
    gamma = 1.0 + 0.1 * jax.random.normal(k[4], (planes,), jnp.float32)
    beta = 0.1 * jax.random.normal(k[5], (planes,), jnp.float32)

    out = jax.block_until_ready(preact_block_forward(x, w1, gamma, beta, w2, wsc, stride))
    ref = jax.block_until_ready(ref_forward(x, w1, gamma, beta, w2, wsc, stride))
    np.testing.assert_allclose(np.asarray(out), np.asarray(ref), rtol=RTOL, atol=ATOL)

    # --- Config B: identity shortcut (stride=1, in_planes == planes) ---
    x2 = jax.random.normal(k[6], (n, planes, 8, 8), jnp.float32)
    w1b = jax.random.normal(k[7], (planes, planes, 3, 3), jnp.float32) * 0.1
    out2 = jax.block_until_ready(preact_block_forward(x2, w1b, gamma, beta, w2, None, 1))
    ref2 = jax.block_until_ready(ref_forward(x2, w1b, gamma, beta, w2, None, 1))
    np.testing.assert_allclose(np.asarray(out2), np.asarray(ref2), rtol=RTOL, atol=ATOL)

    print("KERNEL_OK")
</pallas_src>

<mosaic_0001>
module attributes {stable_mosaic.version = 11 : i64} {
  func.func @conv1_kernel(%arg0: i32, %arg1: memref<2x4x9x9x128xbf16, #tpu.memory_space<vmem>>, %arg2: memref<9x128x128xbf16, #tpu.memory_space<vmem>>, %arg3: memref<2x8x8x128xbf16, #tpu.memory_space<vmem>>, %arg4: memref<1x1x128xf32, #tpu.memory_space<vmem>>, %arg5: memref<1x1x128xf32, #tpu.memory_space<vmem>>) attributes {dimension_semantics = [#tpu.dimension_semantics<parallel>], iteration_bounds = array<i64: 1>, scalar_prefetch = 0 : i64, scratch_operands = 0 : i64, tpu.core_type = #tpu.core_type<tc>, window_params = [{transform_indices = @transform_0, window_bounds = array<i64: 2, 4, 9, 9, 128>}, {pipeline_mode = #tpu.pipeline_mode<synchronous>, transform_indices = @transform_1, window_bounds = array<i64: 9, 128, 128>}, {transform_indices = @transform_2, window_bounds = array<i64: 2, 8, 8, 128>}, {transform_indices = @transform_3, window_bounds = array<i64: 1, 1, 128>}, {transform_indices = @transform_4, window_bounds = array<i64: 1, 1, 128>}]} {
    %c0 = arith.constant 0 : index
    %c0_0 = arith.constant 0 : index
    %c0_1 = arith.constant 0 : index
    %c0_2 = arith.constant 0 : index
    %c0_3 = arith.constant 0 : index
    %0 = vector.load %arg1[%c0, %c0_0, %c0_1, %c0_2, %c0_3] : memref<2x4x9x9x128xbf16, #tpu.memory_space<vmem>>, vector<2x1x8x8x128xbf16>
    %1 = vector.shape_cast %0 : vector<2x1x8x8x128xbf16> to vector<128x128xbf16>
    %c0_4 = arith.constant 0 : index
    %c0_5 = arith.constant 0 : index
    %c0_6 = arith.constant 0 : index
    %2 = vector.load %arg2[%c0_4, %c0_5, %c0_6] : memref<9x128x128xbf16, #tpu.memory_space<vmem>>, vector<1x128x128xbf16>
    %3 = vector.shape_cast %2 : vector<1x128x128xbf16> to vector<128x128xbf16>
    %cst = arith.constant dense<0.000000e+00> : vector<128x128xf32>
    %4 = tpu.matmul %1, %3, %cst {dimension_numbers = #tpu.dot_dimension_numbers<[1], [0], [0], [1], [0, 0, 1, 1], [], []>} : vector<128x128xbf16>, vector<128x128xbf16>, vector<128x128xf32> -> vector<128x128xf32>
    %c0_7 = arith.constant 0 : index
    %c1 = arith.constant 1 : index
    %c0_8 = arith.constant 0 : index
    %c0_9 = arith.constant 0 : index
    %c0_10 = arith.constant 0 : index
    %5 = vector.load %arg1[%c0_7, %c1, %c0_8, %c0_9, %c0_10] : memref<2x4x9x9x128xbf16, #tpu.memory_space<vmem>>, vector<2x1x8x8x128xbf16>
    %6 = vector.shape_cast %5 : vector<2x1x8x8x128xbf16> to vector<128x128xbf16>
    %c1_11 = arith.constant 1 : index
    %c0_12 = arith.constant 0 : index
    %c0_13 = arith.constant 0 : index
    %7 = vector.load %arg2[%c1_11, %c0_12, %c0_13] : memref<9x128x128xbf16, #tpu.memory_space<vmem>>, vector<1x128x128xbf16>
    %8 = vector.shape_cast %7 : vector<1x128x128xbf16> to vector<128x128xbf16>
    %cst_14 = arith.constant dense<0.000000e+00> : vector<128x128xf32>
    %9 = tpu.matmul %6, %8, %cst_14 {dimension_numbers = #tpu.dot_dimension_numbers<[1], [0], [0], [1], [0, 0, 1, 1], [], []>} : vector<128x128xbf16>, vector<128x128xbf16>, vector<128x128xf32> -> vector<128x128xf32>
    %10 = arith.addf %4, %9 : vector<128x128xf32>
    %c0_15 = arith.constant 0 : index
    %c0_16 = arith.constant 0 : index
    %c0_17 = arith.constant 0 : index
    %c1_18 = arith.constant 1 : index
    %c0_19 = arith.constant 0 : index
    %11 = vector.load %arg1[%c0_15, %c0_16, %c0_17, %c1_18, %c0_19] : memref<2x4x9x9x128xbf16, #tpu.memory_space<vmem>>, vector<2x1x8x8x128xbf16>
    %12 = vector.shape_cast %11 : vector<2x1x8x8x128xbf16> to vector<128x128xbf16>
    %c2 = arith.constant 2 : index
    %c0_20 = arith.constant 0 : index
    %c0_21 = arith.constant 0 : index
    %13 = vector.load %arg2[%c2, %c0_20, %c0_21] : memref<9x128x128xbf16, #tpu.memory_space<vmem>>, vector<1x128x128xbf16>
    %14 = vector.shape_cast %13 : vector<1x128x128xbf16> to vector<128x128xbf16>
    %cst_22 = arith.constant dense<0.000000e+00> : vector<128x128xf32>
    %15 = tpu.matmul %12, %14, %cst_22 {dimension_numbers = #tpu.dot_dimension_numbers<[1], [0], [0], [1], [0, 0, 1, 1], [], []>} : vector<128x128xbf16>, vector<128x128xbf16>, vector<128x128xf32> -> vector<128x128xf32>
    %16 = arith.addf %10, %15 : vector<128x128xf32>
    %c0_23 = arith.constant 0 : index
    %c2_24 = arith.constant 2 : index
    %c0_25 = arith.constant 0 : index
    %c0_26 = arith.constant 0 : index
    %c0_27 = arith.constant 0 : index
    %17 = vector.load %arg1[%c0_23, %c2_24, %c0_25, %c0_26, %c0_27] : memref<2x4x9x9x128xbf16, #tpu.memory_space<vmem>>, vector<2x1x8x8x128xbf16>
    %18 = vector.shape_cast %17 : vector<2x1x8x8x128xbf16> to vector<128x128xbf16>
    %c3 = arith.constant 3 : index
    %c0_28 = arith.constant 0 : index
    %c0_29 = arith.constant 0 : index
    %19 = vector.load %arg2[%c3, %c0_28, %c0_29] : memref<9x128x128xbf16, #tpu.memory_space<vmem>>, vector<1x128x128xbf16>
    %20 = vector.shape_cast %19 : vector<1x128x128xbf16> to vector<128x128xbf16>
    %cst_30 = arith.constant dense<0.000000e+00> : vector<128x128xf32>
    %21 = tpu.matmul %18, %20, %cst_30 {dimension_numbers = #tpu.dot_dimension_numbers<[1], [0], [0], [1], [0, 0, 1, 1], [], []>} : vector<128x128xbf16>, vector<128x128xbf16>, vector<128x128xf32> -> vector<128x128xf32>
    %22 = arith.addf %16, %21 : vector<128x128xf32>
    %c0_31 = arith.constant 0 : index
    %c3_32 = arith.constant 3 : index
    %c0_33 = arith.constant 0 : index
    %c0_34 = arith.constant 0 : index
    %c0_35 = arith.constant 0 : index
    %23 = vector.load %arg1[%c0_31, %c3_32, %c0_33, %c0_34, %c0_35] : memref<2x4x9x9x128xbf16, #tpu.memory_space<vmem>>, vector<2x1x8x8x128xbf16>
    %24 = vector.shape_cast %23 : vector<2x1x8x8x128xbf16> to vector<128x128xbf16>
    %c4 = arith.constant 4 : index
    %c0_36 = arith.constant 0 : index
    %c0_37 = arith.constant 0 : index
    %25 = vector.load %arg2[%c4, %c0_36, %c0_37] : memref<9x128x128xbf16, #tpu.memory_space<vmem>>, vector<1x128x128xbf16>
    %26 = vector.shape_cast %25 : vector<1x128x128xbf16> to vector<128x128xbf16>
    %cst_38 = arith.constant dense<0.000000e+00> : vector<128x128xf32>
    %27 = tpu.matmul %24, %26, %cst_38 {dimension_numbers = #tpu.dot_dimension_numbers<[1], [0], [0], [1], [0, 0, 1, 1], [], []>} : vector<128x128xbf16>, vector<128x128xbf16>, vector<128x128xf32> -> vector<128x128xf32>
    %28 = arith.addf %22, %27 : vector<128x128xf32>
    %c0_39 = arith.constant 0 : index
    %c2_40 = arith.constant 2 : index
    %c0_41 = arith.constant 0 : index
    %c1_42 = arith.constant 1 : index
    %c0_43 = arith.constant 0 : index
    %29 = vector.load %arg1[%c0_39, %c2_40, %c0_41, %c1_42, %c0_43] : memref<2x4x9x9x128xbf16, #tpu.memory_space<vmem>>, vector<2x1x8x8x128xbf16>
    %30 = vector.shape_cast %29 : vector<2x1x8x8x128xbf16> to vector<128x128xbf16>
    %c5 = arith.constant 5 : index
    %c0_44 = arith.constant 0 : index
    %c0_45 = arith.constant 0 : index
    %31 = vector.load %arg2[%c5, %c0_44, %c0_45] : memref<9x128x128xbf16, #tpu.memory_space<vmem>>, vector<1x128x128xbf16>
    %32 = vector.shape_cast %31 : vector<1x128x128xbf16> to vector<128x128xbf16>
    %cst_46 = arith.constant dense<0.000000e+00> : vector<128x128xf32>
    %33 = tpu.matmul %30, %32, %cst_46 {dimension_numbers = #tpu.dot_dimension_numbers<[1], [0], [0], [1], [0, 0, 1, 1], [], []>} : vector<128x128xbf16>, vector<128x128xbf16>, vector<128x128xf32> -> vector<128x128xf32>
    %34 = arith.addf %28, %33 : vector<128x128xf32>
    %c0_47 = arith.constant 0 : index
    %c0_48 = arith.constant 0 : index
    %c1_49 = arith.constant 1 : index
    %c0_50 = arith.constant 0 : index
    %c0_51 = arith.constant 0 : index
    %35 = vector.load %arg1[%c0_47, %c0_48, %c1_49, %c0_50, %c0_51] : memref<2x4x9x9x128xbf16, #tpu.memory_space<vmem>>, vector<2x1x8x8x128xbf16>
    %36 = vector.shape_cast %35 : vector<2x1x8x8x128xbf16> to vector<128x128xbf16>
    %c6 = arith.constant 6 : index
    %c0_52 = arith.constant 0 : index
    %c0_53 = arith.constant 0 : index
    %37 = vector.load %arg2[%c6, %c0_52, %c0_53] : memref<9x128x128xbf16, #tpu.memory_space<vmem>>, vector<1x128x128xbf16>
    %38 = vector.shape_cast %37 : vector<1x128x128xbf16> to vector<128x128xbf16>
    %cst_54 = arith.constant dense<0.000000e+00> : vector<128x128xf32>
    %39 = tpu.matmul %36, %38, %cst_54 {dimension_numbers = #tpu.dot_dimension_numbers<[1], [0], [0], [1], [0, 0, 1, 1], [], []>} : vector<128x128xbf16>, vector<128x128xbf16>, vector<128x128xf32> -> vector<128x128xf32>
    %40 = arith.addf %34, %39 : vector<128x128xf32>
    %c0_55 = arith.constant 0 : index
    %c1_56 = arith.constant 1 : index
    %c1_57 = arith.constant 1 : index
    %c0_58 = arith.constant 0 : index
    %c0_59 = arith.constant 0 : index
    %41 = vector.load %arg1[%c0_55, %c1_56, %c1_57, %c0_58, %c0_59] : memref<2x4x9x9x128xbf16, #tpu.memory_space<vmem>>, vector<2x1x8x8x128xbf16>
    %42 = vector.shape_cast %41 : vector<2x1x8x8x128xbf16> to vector<128x128xbf16>
    %c7 = arith.constant 7 : index
    %c0_60 = arith.constant 0 : index
    %c0_61 = arith.constant 0 : index
    %43 = vector.load %arg2[%c7, %c0_60, %c0_61] : memref<9x128x128xbf16, #tpu.memory_space<vmem>>, vector<1x128x128xbf16>
    %44 = vector.shape_cast %43 : vector<1x128x128xbf16> to vector<128x128xbf16>
    %cst_62 = arith.constant dense<0.000000e+00> : vector<128x128xf32>
    %45 = tpu.matmul %42, %44, %cst_62 {dimension_numbers = #tpu.dot_dimension_numbers<[1], [0], [0], [1], [0, 0, 1, 1], [], []>} : vector<128x128xbf16>, vector<128x128xbf16>, vector<128x128xf32> -> vector<128x128xf32>
    %46 = arith.addf %40, %45 : vector<128x128xf32>
    %c0_63 = arith.constant 0 : index
    %c0_64 = arith.constant 0 : index
    %c1_65 = arith.constant 1 : index
    %c1_66 = arith.constant 1 : index
    %c0_67 = arith.constant 0 : index
    %47 = vector.load %arg1[%c0_63, %c0_64, %c1_65, %c1_66, %c0_67] : memref<2x4x9x9x128xbf16, #tpu.memory_space<vmem>>, vector<2x1x8x8x128xbf16>
    %48 = vector.shape_cast %47 : vector<2x1x8x8x128xbf16> to vector<128x128xbf16>
    %c8 = arith.constant 8 : index
    %c0_68 = arith.constant 0 : index
    %c0_69 = arith.constant 0 : index
    %49 = vector.load %arg2[%c8, %c0_68, %c0_69] : memref<9x128x128xbf16, #tpu.memory_space<vmem>>, vector<1x128x128xbf16>
    %50 = vector.shape_cast %49 : vector<1x128x128xbf16> to vector<128x128xbf16>
    %cst_70 = arith.constant dense<0.000000e+00> : vector<128x128xf32>
    %51 = tpu.matmul %48, %50, %cst_70 {dimension_numbers = #tpu.dot_dimension_numbers<[1], [0], [0], [1], [0, 0, 1, 1], [], []>} : vector<128x128xbf16>, vector<128x128xbf16>, vector<128x128xf32> -> vector<128x128xf32>
    %52 = arith.addf %46, %51 : vector<128x128xf32>
    %cst_71 = arith.constant dense<0.000000e+00> : vector<128xf32>
    %53 = vector.multi_reduction <add>, %52, %cst_71 [0] : vector<128x128xf32> to vector<128xf32>
    %54 = vector.shape_cast %53 : vector<128xf32> to vector<1x128xf32>
    %cst_72 = arith.constant 7.812500e-03 : f32
    %55 = vector.broadcast %cst_72 : f32 to vector<1x128xf32>
    %56 = arith.mulf %54, %55 : vector<1x128xf32>
    %57 = vector.broadcast %56 : vector<1x128xf32> to vector<128x128xf32>
    %58 = arith.subf %52, %57 : vector<128x128xf32>
    %59 = arith.mulf %58, %58 : vector<128x128xf32>
    %cst_73 = arith.constant dense<0.000000e+00> : vector<128xf32>
    %60 = vector.multi_reduction <add>, %59, %cst_73 [0] : vector<128x128xf32> to vector<128xf32>
    %61 = vector.shape_cast %60 : vector<128xf32> to vector<1x128xf32>
    %62 = arith.truncf %52 : vector<128x128xf32> to vector<128x128xbf16>
    %63 = vector.shape_cast %62 : vector<128x128xbf16> to vector<2x8x8x128xbf16>
    %c0_74 = arith.constant 0 : index
    %c0_75 = arith.constant 0 : index
    %c0_76 = arith.constant 0 : index
    %c0_77 = arith.constant 0 : index
    %64 = vector.load %arg3[%c0_74, %c0_75, %c0_76, %c0_77] : memref<2x8x8x128xbf16, #tpu.memory_space<vmem>>, vector<2x8x8x128xbf16>
    tpu.vector_store %arg3[%c0_74, %c0_75, %c0_76, %c0_77], %63 {strides = array<i32>} : memref<2x8x8x128xbf16, #tpu.memory_space<vmem>>, vector<2x8x8x128xbf16>,
    %65 = vector.shape_cast %54 : vector<1x128xf32> to vector<1x1x128xf32>
    %c0_78 = arith.constant 0 : index
    %c0_79 = arith.constant 0 : index
    %c0_80 = arith.constant 0 : index
    %66 = vector.load %arg4[%c0_78, %c0_79, %c0_80] : memref<1x1x128xf32, #tpu.memory_space<vmem>>, vector<1x1x128xf32>
    tpu.vector_store %arg4[%c0_78, %c0_79, %c0_80], %65 {strides = array<i32>} : memref<1x1x128xf32, #tpu.memory_space<vmem>>, vector<1x1x128xf32>,
    %67 = vector.shape_cast %61 : vector<1x128xf32> to vector<1x1x128xf32>
    %c0_81 = arith.constant 0 : index
    %c0_82 = arith.constant 0 : index
    %c0_83 = arith.constant 0 : index
    %68 = vector.load %arg5[%c0_81, %c0_82, %c0_83] : memref<1x1x128xf32, #tpu.memory_space<vmem>>, vector<1x1x128xf32>
    tpu.vector_store %arg5[%c0_81, %c0_82, %c0_83], %67 {strides = array<i32>} : memref<1x1x128xf32, #tpu.memory_space<vmem>>, vector<1x1x128xf32>,
    return
  }
  func.func @transform_0(%arg0: i32) -> (i32, i32, i32, i32, i32) {
    %c0_i32 = arith.constant 0 : i32
    %c0_i32_0 = arith.constant 0 : i32
    %c0_i32_1 = arith.constant 0 : i32
    %c0_i32_2 = arith.constant 0 : i32
    %c0_i32_3 = arith.constant 0 : i32
    return %arg0, %c0_i32, %c0_i32_0, %c0_i32_1, %c0_i32_2 : i32, i32, i32, i32, i32
  }
  func.func @transform_1(%arg0: i32) -> (i32, i32, i32) {
    %c0_i32 = arith.constant 0 : i32
    %c0_i32_0 = arith.constant 0 : i32
    %c0_i32_1 = arith.constant 0 : i32
    %c0_i32_2 = arith.constant 0 : i32
    return %c0_i32, %c0_i32_0, %c0_i32_1 : i32, i32, i32
  }
  func.func @transform_2(%arg0: i32) -> (i32, i32, i32, i32) {
    %c0_i32 = arith.constant 0 : i32
    %c0_i32_0 = arith.constant 0 : i32
    %c0_i32_1 = arith.constant 0 : i32
    %c0_i32_2 = arith.constant 0 : i32
    return %arg0, %c0_i32, %c0_i32_0, %c0_i32_1 : i32, i32, i32, i32
  }
  func.func @transform_3(%arg0: i32) -> (i32, i32, i32) {
    %c0_i32 = arith.constant 0 : i32
    %c0_i32_0 = arith.constant 0 : i32
    %c0_i32_1 = arith.constant 0 : i32
    return %arg0, %c0_i32, %c0_i32_0 : i32, i32, i32
  }
  func.func @transform_4(%arg0: i32) -> (i32, i32, i32) {
    %c0_i32 = arith.constant 0 : i32
    %c0_i32_0 = arith.constant 0 : i32
    %c0_i32_1 = arith.constant 0 : i32
    return %arg0, %c0_i32, %c0_i32_0 : i32, i32, i32
  }
}

</mosaic_0001>

<bundles_post_ra>
// kernel: tpu_custom_call.1
= control target key start
LH: loop header
LB: loop body
LE: loop exit
PB: predicated region body
PF: predicated region fallthrough
CT: control target
= control target key end

     0   :  { %10 = vsyncpa [#allocation3], 0  ;;  %vm501_vm0 = vsmask.f32 3328  ;;  %vm502_vm1 = vsmask.f32 7440  ;;  %s5218_s0 = inlined_call_operand.vmem [shape: bf16[2,4,9,9,128], index: 0, kind: input, shape index: {}]   ;;  %s5219_s1 = inlined_call_operand.vmem [shape: bf16[9,128,128], index: 1, kind: input, shape index: {}]   ;;  %s5220_s2 = inlined_call_operand.hbm [shape: bf16[2,8,8,128], index: 2, kind: output, shape index: {0}]   ;;  %s5221_s3 = inlined_call_operand.hbm [shape: f32[1,1,128], index: 3, kind: output, shape index: {1}]   ;;  %s5222_s4 = inlined_call_operand.hbm [shape: f32[1,1,128], index: 4, kind: output, shape index: {2}]  }
   0x1   :  { %v3990_v0 = vld [vmem:[%s5219_s1 + $0x78] sm:$0xff]   ;;  %v3992_v2 = vld [vmem:[%s5219_s1 + $0x70] sm:$0xff]   ;;  %v3994_v4 = vld [vmem:[%s5219_s1 + $0x68] sm:$0xff]  }
   0x2   :  { %v3991_v1 = vld [vmem:[%s5219_s1 + $0x38] sm:$0xff]   ;;  %3681 = vmatprep.subr.bf16.mxu0 %v3990_v0  ;;  %v3993_v3 = vld [vmem:[%s5219_s1 + $0x30] sm:$0xff]   ;;  %v3995_v5 = vld [vmem:[%s5219_s1 + $0x28] sm:$0xff]  }
   0x3   :  { %3713 = vmatprep.subr.bf16.mxu1 %v3991_v1  ;;  %3682 = vmatpush3.bf16.msra.mxu0 %v3990_v0  ;;  %v3996_v6 = vld [vmem:[%s5219_s1 + $0x60] sm:$0xff]   ;;  %v3998_v8 = vld [vmem:[%s5219_s1 + $0x58] sm:$0xff]   ;;  %v4000_v10 = vld [vmem:[%s5219_s1 + $0x50] sm:$0xff]  }
   0x4   :  { %3714 = vmatpush3.bf16.msra.mxu1 %v3991_v1  ;;  %3683 = vmatprep.subr.bf16.mxu0 %v3992_v2  ;;  %v3997_v7 = vld [vmem:[%s5219_s1 + $0x20] sm:$0xff]   ;;  %v3999_v9 = vld [vmem:[%s5219_s1 + $0x18] sm:$0xff]   ;;  %v4001_v11 = vld [vmem:[%s5219_s1 + $0x10] sm:$0xff]  }
   0x5   :  { %3715 = vmatprep.subr.bf16.mxu1 %v3993_v3  ;;  %v4006_v12 = vld [vmem:[%s5218_s0 + $0x48] ss:$8 sps:$4 sm:$0xff]   ;;  %v4004_v16 = vld [vmem:[%s5219_s1 + $0x40] sm:$0xff]   ;;  %v4010_v19 = vld [vmem:[%s5219_s1 + $0xb8] sm:$0xff]  }
   0x6   :  { %v4007_v13 = vld [vmem:[%s5218_s0] ss:$8 sps:$4 sm:$0xff]   ;;  %3697 = vmatprep.mubr.bf16.mxu0 %v4006_v12  ;;  %v4011_v20 = vld [vmem:[%s5219_s1 + $0xf8] sm:$0xff]   ;;  %v4012_v22 = vld [vmem:[%s5219_s1 + $0xb0] sm:$0xff]  }
   0x7   :  { %3684 = vmatpush3.bf16.msra.mxu0 %v3992_v2  ;;  %3729 = vmatprep.mubr.bf16.mxu1 %v4007_v13  ;;  %v4002_v14 = vld [vmem:[%s5219_s1 + $0x48] sm:$0xff]   ;;  %v4005_v17 = vld [vmem:[%s5219_s1] sm:$0xff]   ;;  %v4009_v21 = vld [vmem:[%s5218_s0 + $0x10] ss:$8 sps:$4 sm:$0xff]  }
   0x8   :  { %3716 = vmatpush3.bf16.msra.mxu1 %v3993_v3  ;;  %3685 = vmatprep.subr.bf16.mxu0 %v3994_v4  ;;  %v4003_v15 = vld [vmem:[%s5219_s1 + $0x8] sm:$0xff]   ;;  %v4008_v18 = vld [vmem:[%s5218_s0 + $0x58] ss:$8 sps:$4 sm:$0xff]   ;;  %v4013_v23 = vld [vmem:[%s5219_s1 + $0xf0] sm:$0xff]  }
   0x9   :  { %3717 = vmatprep.subr.bf16.mxu1 %v3995_v5  ;;  %v4014_v24 = vld [vmem:[%s5218_s0 + $0x68] ss:$8 sps:$4 sm:$0xff]   ;;  %v4016_v26 = vld [vmem:[%s5218_s0 + $0x78] ss:$8 sps:$4 sm:$0xff]   ;;  %v470_v42 = vld [vmem:[%s5218_s0 + $0x4] sm:$0x1] }
   0xa   :  { %v4015_v25 = vld [vmem:[%s5218_s0 + $0x20] ss:$8 sps:$4 sm:$0xff]   ;;  %v4017_v29 = vld [vmem:[%s5218_s0 + $0x30] ss:$8 sps:$4 sm:$0xff]   ;;  %v472_v45 = vld [vmem:[%s5218_s0 + $0xc] sm:$0x1] }
   0xb   :  { %3686 = vmatpush3.bf16.msra.mxu0 %v3994_v4  ;;  %v4018_v27 = vld [vmem:[%s5219_s1 + $0xa8] sm:$0xff]   ;;  %v4020_v30 = vld [vmem:[%s5219_s1 + $0xa0] sm:$0xff]   ;;  %v4026_v35 = vld [vmem:[%s5219_s1 + $0x98] sm:$0xff]   ;;  %v514_v49 = vshll.u32 %v470_v42, 16  ;;  %v528_v53 = vshll.u32 %v472_v45, 16 }
   0xc   :  { %3718 = vmatpush3.bf16.msra.mxu1 %v3995_v5  ;;  %3687 = vmatprep.subr.bf16.mxu0 %v3996_v6  ;;  %v4019_v28 = vld [vmem:[%s5219_s1 + $0xe8] sm:$0xff]   ;;  %v4021_v31 = vld [vmem:[%s5219_s1 + $0xe0] sm:$0xff]   ;;  %v4025_v36 = vld [vmem:[%s5218_s0 + $0x130] ss:$8 sps:$4 sm:$0xff]  }
   0xd   :  { %3719 = vmatprep.subr.bf16.mxu1 %v3997_v7  ;;  %v4022_v32 = vld [vmem:[%s5218_s0 + $0x168] ss:$8 sps:$4 sm:$0xff]   ;;  %v4024_v34 = vld [vmem:[%s5218_s0 + $0x178] ss:$8 sps:$4 sm:$0xff]   ;;  %v516_v57 = vrot.slane %v514_v49, 5  ;;  %v530_v62 = vrot.slane %v528_v53, 5  ;;  %vm4374_vm2 = vmor %vm501_vm0, %vm502_vm1 }
   0xe   :  { %v4023_v33 = vld [vmem:[%s5218_s0 + $0x120] ss:$8 sps:$4 sm:$0xff]   ;;  %v4027_v37 = vld [vmem:[%s5219_s1 + $0xd8] sm:$0xff]   ;;  %v4028_v38 = vld [vmem:[%s5219_s1 + $0x90] sm:$0xff]  }
   0xf   :  { %3688 = vmatpush3.bf16.msra.mxu0 %v3996_v6  ;;  %v4029_v39 = vld [vmem:[%s5219_s1 + $0xd0] sm:$0xff]   ;;  %v469_v41 = vld [vmem:[%s5218_s0] sm:$0xf]  ;;  %v471_v43 = vld [vmem:[%s5218_s0 + $0x8] sm:$0xf] }
  0x10   :  { %3720 = vmatpush3.bf16.msra.mxu1 %v3997_v7  ;;  %3689 = vmatprep.subr.bf16.mxu0 %v3998_v8  ;;  %v4030_v40 = vld [vmem:[%s5218_s0 + $0x188] ss:$8 sps:$4 sm:$0xff]   ;;  %v505_v47 = vshrl.u32 %v469_v41, 16  ;;  %v508_v48 = vshll.u32 %v469_v41, 16  ;;  %v519_v50 = vshrl.u32 %v471_v43, 16  ;;  %v522_v52 = vshll.u32 %v471_v43, 16 }
  0x11   :  { %3721 = vmatprep.subr.bf16.mxu1 %v3999_v9  ;;  %v4031_v44 = vld [vmem:[%s5218_s0 + $0x140] ss:$8 sps:$4 sm:$0xff]   ;;  %v473_v59 = vld [vmem:[%s5218_s0 + $0x10] sm:$0xf]  ;;  %v474_v63 = vld [vmem:[%s5218_s0 + $0x14] sm:$0x1] }
  0x12   :  { %v4034_v46 = vld [vmem:[%s5219_s1 + $0x88] sm:$0xff]   ;;  %v4032_v54 = vld [vmem:[%s5218_s0 + $0x198] ss:$8 sps:$4 sm:$0xff]   ;;  %v507_v55 = vrot.slane %v505_v47, 4  ;;  %v510_v56 = vrot.slane %v508_v48, 5  ;;  %v521_v58 = vrot.slane %v519_v50, 4 }
  0x13   :  { %3690 = vmatpush3.bf16.msra.mxu0 %v3998_v8  ;;  %v4035_v51 = vld [vmem:[%s5219_s1 + $0xc8] sm:$0xff]   ;;  %v4033_v60 = vld [vmem:[%s5218_s0 + $0x150] ss:$8 sps:$4 sm:$0xff]   ;;  %v524_v61 = vrot.slane %v522_v52, 5  ;;  %v4036_v1 = vld [vmem:[%s5219_s1 + $0x80] sm:$0xff]   ;;  %v533_v4 = vshrl.u32 %v473_v59, 16 }
  0x14   :  { %3722 = vmatpush3.bf16.msra.mxu1 %v3999_v9  ;;  %3691 = vmatprep.subr.bf16.mxu0 %v4000_v10  ;;  %v475_v0 = vld [vmem:[%s5218_s0 + $0x18] sm:$0xf]  ;;  %v511_v2 = vor.u32 %v510_v56, %v507_v55  ;;  %v476_v3 = vld [vmem:[%s5218_s0 + $0x1c] sm:$0x1]  ;;  %v536_v5 = vshll.u32 %v473_v59, 16  ;;  %v542_v6 = vshll.u32 %v474_v63, 16 }
  0x15   :  { %3723 = vmatprep.subr.bf16.mxu1 %v4001_v11  ;;  %v4037_v7 = vld [vmem:[%s5219_s1 + $0xc0] sm:$0xff]   ;;  %v525_v9 = vor.u32 %v524_v61, %v521_v58  ;;  %v556_v12 = vshll.u32 %v476_v3, 16  ;;  %v4043_v48 = vld [vmem:[%s5219_s1 + $0x170] sm:$0xff]   ;;  %v483_v59 = vld [vmem:[%s5218_s0 + $0x38] sm:$0xf] }
  0x16   :  { %v512_v13 = vrot.slane %v511_v2, 4  ;;  %v481_v55 = vld [vmem:[%s5218_s0 + $0x30] sm:$0xf]  ;;  %v482_v56 = vld [vmem:[%s5218_s0 + $0x34] sm:$0x1]  ;;  %v4047_v63 = vld [vmem:[%s5219_s1 + $0x168] sm:$0xff]  }
  0x17   :  { %3692 = vmatpush3.bf16.msra.mxu0 %v4000_v10  ;;  %v547_v10 = vshrl.u32 %v475_v0, 16  ;;  %v589_v61 = vshrl.u32 %v481_v55, 16  ;;  %v603_v2 = vshrl.u32 %v483_v59, 16  ;;  %v606_v3 = vshll.u32 %v483_v59, 16 }
  0x18   :  { %3724 = vmatpush3.bf16.msra.mxu1 %v4001_v11  ;;  %3693 = vmatprep.subr.bf16.mxu0 %v4002_v14  ;;  %v550_v11 = vshll.u32 %v475_v0, 16 }
  0x19   :  { %3725 = vmatprep.subr.bf16.mxu1 %v4003_v15 }
  0x1b   :  { %3694 = vmatpush3.bf16.msra.mxu0 %v4002_v14  ;;  %v535_v14 = vrot.slane %v533_v4, 4 }
  0x1c   :  { %3726 = vmatpush3.bf16.msra.mxu1 %v4003_v15  ;;  %3695 = vmatprep.subr.bf16.mxu0 %v4004_v16  ;;  %v538_v15 = vrot.slane %v536_v5, 5  ;;  %v591_v5 = vrot.slane %v589_v61, 4 }
  0x1d   :  { %3727 = vmatprep.subr.bf16.mxu1 %v4005_v17 }
  0x1f   :  { %3696 = vmatpush3.bf16.msra.mxu0 %v4004_v16  ;;  %v544_v16 = vrot.slane %v542_v6, 5 }
  0x20   :  { %3728 = vmatpush3.bf16.msra.mxu1 %v4005_v17  ;;  %3745 = vmatprep.subr.bf16.mxu0 %v4010_v19  ;;  %v526_v17 = vrot.slane %v525_v9, 4 }
  0x21   :  { %3777 = vmatprep.subr.bf16.mxu1 %v4011_v20 }
  0x22   :  { %3698 = vmatmul.mubr.bf16.vlgmr.msra.gmra.mxu0 %v4008_v18  ;;  %v4038_v18 = vld [vmem:[%s5218_s0 + $0x90] ss:$8 sps:$4 sm:$0xff]  }
  0x23   :  { %3730 = vmatmul.mubr.bf16.vlgmr.msra.gmra.mxu1 %v4009_v21  ;;  %3746 = vmatpush3.bf16.msra.mxu0 %v4010_v19  ;;  %v549_v19 = vrot.slane %v547_v10, 4  ;;  %v558_v21 = vrot.slane %v556_v12, 5  ;;  %v605_v10 = vrot.slane %v603_v2, 4  ;;  %v4045_v12 = vld [vmem:[%s5218_s0 + $0xc0] ss:$8 sps:$4 sm:$0xff]  }
  0x24   :  { %3778 = vmatpush3.bf16.msra.mxu1 %v4011_v20  ;;  %3747 = vmatprep.subr.bf16.mxu0 %v4012_v22  ;;  %v552_v20 = vrot.slane %v550_v11, 5  ;;  %v608_v11 = vrot.slane %v606_v3, 5 }
  0x25   :  { %3779 = vmatprep.subr.bf16.mxu1 %v4013_v23  ;;  %3701 = vmatprep.mubr.bf16.mxu0 %v4014_v24  ;;  %v531_v24 = vsel %vm4374_vm2, %v526_v17, %v530_v62  ;;  %v592_v62 = vshll.u32 %v481_v55, 16  ;;  %v4055_v55 = vld [vmem:[%s5219_s1 + $0x150] sm:$0xff]  }
  0x26   :  { %3733 = vmatprep.mubr.bf16.mxu1 %v4015_v25  ;;  %v553_v25 = vor.u32 %v552_v20, %v549_v19  ;;  %v609_v19 = vor.u32 %v608_v11, %v605_v10 }
  0x27   :  { %3748 = vmatpush3.bf16.msra.mxu0 %v4012_v22  ;;  %v517_v22 = vsel %vm4374_vm2, %v512_v13, %v516_v57  ;;  %v4046_v57 = vld [vmem:[%s5219_s1 + $0x128] sm:$0xff]   ;;  %v594_v6 = vrot.slane %v592_v62, 5  ;;  %v4048_v13 = vld [vmem:[%s5219_s1 + $0x120] sm:$0xff]  }
  0x28   :  { %3780 = vmatpush3.bf16.msra.mxu1 %v4013_v23  ;;  %3749 = vmatprep.subr.bf16.mxu0 %v4018_v27  ;;  %v539_v23 = vor.u32 %v538_v15, %v535_v14 }
  0x29   :  { %3781 = vmatprep.subr.bf16.mxu1 %v4019_v28  ;;  %v595_v15 = vor.u32 %v594_v6, %v591_v5  ;;  %v4059_v6 = vld [vmem:[%s5219_s1 + $0x148] sm:$0xff]  }
  0x2a   :  { %3702 = vmatmul.mubr.bf16.gmra.mxu0 %v4016_v26  ;;  %v3122_v26 = vcombine.low %v517_v22, %v531_v24  ;;  %v610_v22 = vrot.slane %v609_v19, 4  ;;  %v496_v19 = vld [vmem:[%s5218_s0 + $0x14c] sm:$0x1] }
  0x2b   :  { %3734 = vmatmul.mubr.bf16.gmra.mxu1 %v4017_v29  ;;  %3750 = vmatpush3.bf16.msra.mxu0 %v4018_v27  ;;  %v540_v27 = vrot.slane %v539_v23, 4  ;;  %v554_v29 = vrot.slane %v553_v25, 4  ;;  %v596_v20 = vrot.slane %v595_v15, 4  ;;  %v485_v23 = vld [vmem:[%s5218_s0 + $0x120] sm:$0xf] }
  0x2c   :  { %3782 = vmatpush3.bf16.msra.mxu1 %v4019_v28  ;;  %3751 = vmatprep.subr.bf16.mxu0 %v4020_v30  ;;  %v4040_v28 = vld [vmem:[%s5219_s1 + $0x138] sm:$0xff]   ;;  %v486_v25 = vld [vmem:[%s5218_s0 + $0x124] sm:$0x1] }
  0x2d   :  { %3783 = vmatprep.subr.bf16.mxu1 %v4021_v31  ;;  %3705 = vmatprep.mubr.bf16.mxu0 %v4022_v32  ;;  %v477_v32 = vld [vmem:[%s5218_s0 + $0x20] sm:$0xf]  ;;  %v494_v15 = vld [vmem:[%s5218_s0 + $0x144] sm:$0x1] }
  0x2e   :  { %3737 = vmatprep.mubr.bf16.mxu1 %v4023_v33  ;;  %v478_v33 = vld [vmem:[%s5218_s0 + $0x24] sm:$0x1] }
  0x2f   :  { %3752 = vmatpush3.bf16.msra.mxu0 %v4020_v30  ;;  %v4039_v30 = vld [vmem:[%s5218_s0 + $0xa0] ss:$8 sps:$4 sm:$0xff]  }
  0x30   :  { %3784 = vmatpush3.bf16.msra.mxu1 %v4021_v31  ;;  %3753 = vmatprep.subr.bf16.mxu0 %v4026_v35  ;;  %v4041_v31 = vld [vmem:[%s5219_s1 + $0x178] sm:$0xff]  }
  0x31   :  { %3785 = vmatprep.subr.bf16.mxu1 %v4027_v37 }
  0x32   :  { %3706 = vmatmul.mubr.bf16.gmra.mxu0 %v4024_v34  ;;  %v545_v34 = vsel %vm4374_vm2, %v540_v27, %v544_v16  ;;  %v488_v27 = vld [vmem:[%s5218_s0 + $0x12c] sm:$0x1] }
  0x33   :  { %3738 = vmatmul.mubr.bf16.gmra.mxu1 %v4025_v36  ;;  %3754 = vmatpush3.bf16.msra.mxu0 %v4026_v35  ;;  %v479_v35 = vld [vmem:[%s5218_s0 + $0x28] sm:$0xf]  ;;  %v480_v36 = vld [vmem:[%s5218_s0 + $0x2c] sm:$0x1] }
  0x34   :  { %3786 = vmatpush3.bf16.msra.mxu1 %v4027_v37  ;;  %3755 = vmatprep.subr.bf16.mxu0 %v4028_v38  ;;  %v561_v37 = vshrl.u32 %v477_v32, 16  ;;  %v575_v41 = vshrl.u32 %v479_v35, 16  ;;  %v578_v42 = vshll.u32 %v479_v35, 16  ;;  %v584_v47 = vshll.u32 %v480_v36, 16  ;;  %v4052_v36 = vld [vmem:[%s5219_s1 + $0x118] sm:$0xff]  }
  0x35   :  { %3787 = vmatprep.subr.bf16.mxu1 %v4029_v39  ;;  %3709 = vmatprep.mubr.bf16.mxu0 %v4030_v40  ;;  %v570_v40 = vshll.u32 %v478_v33, 16  ;;  %v640_v35 = vshll.u32 %v488_v27, 16  ;;  %v696_v27 = vshll.u32 %v496_v19, 16 }
  0x36   :  { %3741 = vmatprep.mubr.bf16.mxu1 %v4031_v44  ;;  %v4042_v44 = vld [vmem:[%s5219_s1 + $0x130] sm:$0xff]   ;;  %v563_v45 = vrot.slane %v561_v37, 4  ;;  %v577_v49 = vrot.slane %v575_v41, 4  ;;  %v580_v50 = vrot.slane %v578_v42, 5 }
  0x37   :  { %3756 = vmatpush3.bf16.msra.mxu0 %v4028_v38  ;;  %v564_v38 = vshll.u32 %v477_v32, 16  ;;  %v572_v53 = vrot.slane %v570_v40, 5  ;;  %v4053_v40 = vld [vmem:[%s5219_s1 + $0x158] sm:$0xff]  }
  0x38   :  { %3788 = vmatpush3.bf16.msra.mxu1 %v4029_v39  ;;  %3757 = vmatprep.subr.bf16.mxu0 %v4034_v46  ;;  %v559_v39 = vsel %vm4374_vm2, %v554_v29, %v558_v21  ;;  %v581_v58 = vor.u32 %v580_v50, %v577_v49  ;;  %v4049_v21 = vld [vmem:[%s5219_s1 + $0x160] sm:$0xff]   ;;  %v617_v29 = vshrl.u32 %v485_v23, 16  ;;  %v491_v49 = vld [vmem:[%s5218_s0 + $0x138] sm:$0xf]  ;;  %v492_v50 = vld [vmem:[%s5218_s0 + $0x13c] sm:$0x1] }
  0x39   :  { %3789 = vmatprep.subr.bf16.mxu1 %v4035_v51  ;;  %v3123_v43 = vcombine.low %v545_v34, %v559_v39  ;;  %v4050_v39 = vld [vmem:[%s5218_s0 + $0x1b0] ss:$8 sps:$4 sm:$0xff]   ;;  %v668_v59 = vshll.u32 %v492_v50, 16 }
  0x3a   :  { %3710 = vmatmul.mubr.bf16.gmra.mxu0 %v4032_v54  ;;  %v586_v54 = vrot.slane %v584_v47, 5  ;;  %v582_v4 = vrot.slane %v581_v58, 4  ;;  %v619_v37 = vrot.slane %v617_v29, 4  ;;  %v662_v58 = vshll.u32 %v491_v49, 16 }
  0x3b   :  { %3742 = vmatmul.mubr.bf16.gmra.mxu1 %v4033_v60  ;;  %3758 = vmatpush3.bf16.msra.mxu0 %v4034_v46  ;;  %v566_v46 = vrot.slane %v564_v38, 5  ;;  %v484_v60 = vld [vmem:[%s5218_s0 + $0x3c] sm:$0x1]  ;;  %v670_v5 = vrot.slane %v668_v59, 5 }
  0x3c   :  { %3790 = vmatpush3.bf16.msra.mxu1 %v4035_v51  ;;  %3759 = vmatprep.subr.bf16.mxu0 %v4036_v1  ;;  %v4044_v51 = vld [vmem:[%s5218_s0 + $0xb0] ss:$8 sps:$4 sm:$0xff]   ;;  %v587_v14 = vsel %vm4374_vm2, %v582_v4, %v586_v54  ;;  %v664_v4 = vrot.slane %v662_v58, 5 }
  0x3d   :  { %3791 = vmatprep.subr.bf16.mxu1 %v4037_v7  ;;  %3793 = vmatprep.mubr.bf16.mxu1 %v4038_v18  ;;  %v567_v52 = vor.u32 %v566_v46, %v563_v45  ;;  %v489_v45 = vld [vmem:[%s5218_s0 + $0x130] sm:$0xf] }
  0x3e   :  { %3761 = vmatprep.mubr.bf16.mxu0 %v3122_v26  ;;  %v487_v26 = vld [vmem:[%s5218_s0 + $0x128] sm:$0xf]  ;;  %v4054_v46 = vld [vmem:[%s5219_s1 + $0x110] sm:$0xff]  }
  0x3f   :  { %3760 = vmatpush3.bf16.msra.mxu0 %v4036_v1  ;;  %v568_v0 = vrot.slane %v567_v52, 4  ;;  %v598_v1 = vshll.u32 %v482_v56, 16  ;;  %v631_v33 = vshrl.u32 %v487_v26, 16  ;;  %v634_v34 = vshll.u32 %v487_v26, 16 }
  0x40   :  { %3792 = vmatpush3.bf16.msra.mxu1 %v4037_v7  ;;  %3809 = vmatprep.subr.bf16.mxu0 %v4040_v28  ;;  %v612_v7 = vshll.u32 %v484_v60, 16  ;;  %v645_v52 = vshrl.u32 %v489_v45, 16 }
  0x41   :  { %3841 = vmatprep.subr.bf16.mxu1 %v4041_v31  ;;  %v573_v9 = vsel %vm4374_vm2, %v568_v0, %v572_v53  ;;  %v600_v16 = vrot.slane %v598_v1, 5  ;;  %v633_v42 = vrot.slane %v631_v33, 4  ;;  %v648_v53 = vshll.u32 %v489_v45, 16  ;;  %v4051_v0 = vld [vmem:[%s5218_s0 + $0x1c0] ss:$8 sps:$4 sm:$0xff]   ;;  %v4531_v33 = vld [vmem:[%s5219_s1 + $0x1b8] sm:$0xff]  }
  0x42   :  { %3762 = vmatmul.mubr.bf16.vlgmr.msra.gmra.mxu0 %v3123_v43  ;;  %v614_v17 = vrot.slane %v612_v7, 5  ;;  %v3124_v18 = vcombine.low %v573_v9, %v587_v14  ;;  %v636_v43 = vrot.slane %v634_v34, 5  ;;  %v647_v61 = vrot.slane %v645_v52, 4  ;;  %v4058_v1 = vld [vmem:[%s5219_s1 + $0x108] sm:$0xff]  }
  0x43   :  { %3794 = vmatmul.mubr.bf16.vlgmr.msra.gmra.mxu1 %v4039_v30  ;;  %3810 = vmatpush3.bf16.msra.mxu0 %v4040_v28  ;;  %v601_v24 = vsel %vm4374_vm2, %v596_v20, %v600_v16  ;;  %v620_v30 = vshll.u32 %v485_v23, 16  ;;  %v650_v62 = vrot.slane %v648_v53, 5  ;;  %v495_v16 = vld [vmem:[%s5218_s0 + $0x148] sm:$0xf]  ;;  %v4060_v23 = vld [vmem:[%s5219_s1 + $0x100] sm:$0xff]  }
  0x44   :  { %3842 = vmatpush3.bf16.msra.mxu1 %v4041_v31  ;;  %3811 = vmatprep.subr.bf16.mxu0 %v4042_v44  ;;  %v615_v28 = vsel %vm4374_vm2, %v610_v22, %v614_v17  ;;  %v626_v31 = vshll.u32 %v486_v25, 16  ;;  %v687_v22 = vshrl.u32 %v495_v16, 16  ;;  %v690_v26 = vshll.u32 %v495_v16, 16 }
  0x45   :  { %3843 = vmatprep.subr.bf16.mxu1 %v4043_v48  ;;  %3797 = vmatprep.mubr.bf16.mxu1 %v4044_v51  ;;  %v3125_v32 = vcombine.low %v601_v24, %v615_v28  ;;  %v622_v38 = vrot.slane %v620_v30, 5  ;;  %v637_v51 = vor.u32 %v636_v43, %v633_v42  ;;  %v651_v9 = vor.u32 %v650_v62, %v647_v61  ;;  %v4061_v28 = vld [vmem:[%s5219_s1 + $0x140] sm:$0xff]  }
  0x46   :  { %3765 = vmatprep.mubr.bf16.mxu0 %v3124_v18  ;;  %v628_v41 = vrot.slane %v626_v31, 5  ;;  %v692_v34 = vrot.slane %v690_v26, 5  ;;  %v3240_v26 = vld [vmem:[%s5218_s0 + $0xa8] sm:$0xf] }
  0x47   :  { %3812 = vmatpush3.bf16.msra.mxu0 %v4042_v44  ;;  %v642_v44 = vrot.slane %v640_v35, 5  ;;  %v623_v47 = vor.u32 %v622_v38, %v619_v37  ;;  %v638_v60 = vrot.slane %v637_v51, 4  ;;  %v698_v35 = vrot.slane %v696_v27, 5  ;;  %v497_v37 = vld [vmem:[%s5218_s0 + $0x150] sm:$0xf] }
  0x48   :  { %3844 = vmatpush3.bf16.msra.mxu1 %v4043_v48  ;;  %3813 = vmatprep.subr.bf16.mxu0 %v4046_v57  ;;  %v490_v48 = vld [vmem:[%s5218_s0 + $0x134] sm:$0x1]  ;;  %v701_v43 = vshrl.u32 %v497_v37, 16 }
  0x49   :  { %3845 = vmatprep.subr.bf16.mxu1 %v4047_v63  ;;  %v654_v54 = vshll.u32 %v490_v48, 16  ;;  %v624_v56 = vrot.slane %v623_v47, 4  ;;  %v643_v7 = vsel %vm4374_vm2, %v638_v60, %v642_v44  ;;  %v704_v44 = vshll.u32 %v497_v37, 16 }
  0x4a   :  { %3766 = vmatmul.mubr.bf16.gmra.mxu0 %v3125_v32  ;;  %v689_v32 = vrot.slane %v687_v22, 4  ;;  %v703_v52 = vrot.slane %v701_v43, 4 }
  0x4b   :  { %3798 = vmatmul.mubr.bf16.gmra.mxu1 %v4045_v12  ;;  %3814 = vmatpush3.bf16.msra.mxu0 %v4046_v57  ;;  %v659_v57 = vshrl.u32 %v491_v49, 16  ;;  %v629_v2 = vsel %vm4374_vm2, %v624_v56, %v628_v41  ;;  %v652_v12 = vrot.slane %v651_v9, 4  ;;  %v500_v41 = vld [vmem:[%s5218_s0 + $0x15c] sm:$0x1]  ;;  %v706_v53 = vrot.slane %v704_v44, 5 }
  0x4c   :  { %3846 = vmatpush3.bf16.msra.mxu1 %v4047_v63  ;;  %3815 = vmatprep.subr.bf16.mxu0 %v4048_v13  ;;  %v656_v63 = vrot.slane %v654_v54, 5  ;;  %v3126_v10 = vcombine.low %v629_v2, %v643_v7  ;;  %v693_v42 = vor.u32 %v692_v34, %v689_v32  ;;  %v724_v50 = vshll.u32 %v500_v41, 16  ;;  %v4062_v2 = vld [vmem:[%s5218_s0 + $0xd8] ss:$8 sps:$4 sm:$0xff]   ;;  %v3237_v9 = vld [vmem:[%s5218_s0 + $0x9c] sm:$0x1] }
  0x4d   :  { %3847 = vmatprep.subr.bf16.mxu1 %v4049_v21  ;;  %3801 = vmatprep.mubr.bf16.mxu1 %v4050_v39  ;;  %v661_v3 = vrot.slane %v659_v57, 4  ;;  %v498_v39 = vld [vmem:[%s5218_s0 + $0x154] sm:$0x1]  ;;  %v707_v61 = vor.u32 %v706_v53, %v703_v52  ;;  %v1480_v16 = vshll.u32 %v3237_v9, 16  ;;  %v4068_v53 = vld [vmem:[%s5218_s0 + $0xf8] ss:$8 sps:$4 sm:$0xff]  }
  0x4e   :  { %3769 = vmatprep.mubr.bf16.mxu0 %v3126_v10  ;;  %v657_v18 = vsel %vm4374_vm2, %v652_v12, %v656_v63  ;;  %v710_v45 = vshll.u32 %v498_v39, 16  ;;  %v694_v51 = vrot.slane %v693_v42, 4  ;;  %v726_v59 = vrot.slane %v724_v50, 5 }
  0x4f   :  { %3816 = vmatpush3.bf16.msra.mxu0 %v4048_v13  ;;  %v665_v11 = vor.u32 %v664_v4, %v661_v3  ;;  %v493_v13 = vld [vmem:[%s5218_s0 + $0x140] sm:$0xf]  ;;  %v3234_v4 = vld [vmem:[%s5218_s0 + $0x90] sm:$0xf]  ;;  %v1482_v22 = vrot.slane %v1480_v16, 5 }
  0x50   :  { %3848 = vmatpush3.bf16.msra.mxu1 %v4049_v21  ;;  %3817 = vmatprep.subr.bf16.mxu0 %v4052_v36  ;;  %v673_v17 = vshrl.u32 %v493_v13, 16  ;;  %v676_v20 = vshll.u32 %v493_v13, 16  ;;  %v682_v21 = vshll.u32 %v494_v15, 16  ;;  %v712_v54 = vrot.slane %v710_v45, 5  ;;  %v3247_v16 = vld [vmem:[%s5218_s0 + $0xc4] sm:$0x1] }
  0x51   :  { %3849 = vmatprep.subr.bf16.mxu1 %v4053_v40  ;;  %v666_v14 = vrot.slane %v665_v11, 4  ;;  %v699_v60 = vsel %vm4374_vm2, %v694_v51, %v698_v35  ;;  %v1457_v10 = vshrl.u32 %v3234_v4, 16  ;;  %v1460_v11 = vshll.u32 %v3234_v4, 16 }
  0x52   :  { %v675_v25 = vrot.slane %v673_v17, 4  ;;  %v678_v30 = vrot.slane %v676_v20, 5  ;;  %v684_v31 = vrot.slane %v682_v21, 5  ;;  %v1499_v35 = vshrl.u32 %v3240_v26, 16 }
  0x53   :  { %3818 = vmatpush3.bf16.msra.mxu0 %v4052_v36  ;;  %3802 = vmatmul.mubr.bf16.gmra.mxu1 %v4051_v0  ;;  %v671_v24 = vsel %vm4374_vm2, %v666_v14, %v670_v5  ;;  %v4056_v36 = vld [vmem:[%s5218_s0 + $0x1d0] ss:$8 sps:$4 sm:$0xff]   ;;  %v708_v0 = vrot.slane %v707_v61, 4  ;;  %v3235_v5 = vld [vmem:[%s5218_s0 + $0x94] sm:$0x1]  ;;  %v1459_v17 = vrot.slane %v1457_v10, 4 }
  0x54   :  { %3850 = vmatpush3.bf16.msra.mxu1 %v4053_v40  ;;  %3819 = vmatprep.subr.bf16.mxu0 %v4054_v46  ;;  %v3127_v29 = vcombine.low %v657_v18, %v671_v24  ;;  %v679_v38 = vor.u32 %v678_v30, %v675_v25  ;;  %v499_v40 = vld [vmem:[%s5218_s0 + $0x158] sm:$0xf]  ;;  %v1466_v12 = vshll.u32 %v3235_v5, 16  ;;  %v1462_v18 = vrot.slane %v1460_v11, 5  ;;  %v3238_v24 = vld [vmem:[%s5218_s0 + $0xa0] sm:$0xf] }
  0x55   :  { %3851 = vmatprep.subr.bf16.mxu1 %v4055_v55  ;;  %3805 = vmatprep.mubr.bf16.mxu1 %v4056_v36  ;;  %v715_v48 = vshrl.u32 %v499_v40, 16  ;;  %v718_v49 = vshll.u32 %v499_v40, 16  ;;  %v713_v3 = vsel %vm4374_vm2, %v708_v0, %v712_v54  ;;  %v3239_v25 = vld [vmem:[%s5218_s0 + $0xa4] sm:$0x1]  ;;  %v1485_v30 = vshrl.u32 %v3238_v24, 16 }
  0x56   :  { %3770 = vmatmul.mubr.bf16.gmra.mxu0 %v3127_v29  ;;  %v680_v47 = vrot.slane %v679_v38, 4  ;;  %v1468_v19 = vrot.slane %v1466_v12, 5  ;;  %v3241_v29 = vld [vmem:[%s5218_s0 + $0xac] sm:$0x1]  ;;  %v1494_v32 = vshll.u32 %v3239_v25, 16  ;;  %v1502_v36 = vshll.u32 %v3240_v26, 16 }
  0x57   :  { %3820 = vmatpush3.bf16.msra.mxu0 %v4054_v46  ;;  %v4551_v46 = vld [vmem:[%s5219_s1 + $0x1f8] sm:$0xff]   ;;  %v717_v57 = vrot.slane %v715_v48, 4  ;;  %v720_v58 = vrot.slane %v718_v49, 5  ;;  %v1508_v37 = vshll.u32 %v3241_v29, 16  ;;  %v1487_v39 = vrot.slane %v1485_v30, 4  ;;  %v4072_v11 = vld [vmem:[%s5219_s1 + $0x1a0] sm:$0xff]  }
  0x58   :  { %3852 = vmatpush3.bf16.msra.mxu1 %v4055_v55  ;;  %3821 = vmatprep.subr.bf16.mxu0 %v4058_v1  ;;  %v4057_v55 = vld [vmem:[%s5218_s0 + $0x1e0] ss:$8 sps:$4 sm:$0xff]   ;;  %v685_v56 = vsel %vm4374_vm2, %v680_v47, %v684_v31  ;;  %v1488_v31 = vshll.u32 %v3238_v24, 16  ;;  %v1496_v41 = vrot.slane %v1494_v32, 5  ;;  %v1501_v43 = vrot.slane %v1499_v35, 4  ;;  %v4066_v47 = vld [vmem:[%s5219_s1 + $0x1b0] sm:$0xff]  }
  0x59   :  { %3853 = vmatprep.subr.bf16.mxu1 %v4059_v6  ;;  %v3128_v62 = vcombine.low %v685_v56, %v699_v60  ;;  %v721_v63 = vor.u32 %v720_v58, %v717_v57  ;;  %v1504_v44 = vrot.slane %v1502_v36, 5  ;;  %v1510_v45 = vrot.slane %v1508_v37, 5  ;;  %v3243_v56 = vld [vmem:[%s5218_s0 + $0xb4] sm:$0x1]  ;;  %v4070_v57 = vld [vmem:[%s5219_s1 + $0x1a8] sm:$0xff]   ;;  %v4076_v35 = vld [vmem:[%s5219_s1 + $0x198] sm:$0xff]  }
  0x5a   :  { %v1490_v40 = vrot.slane %v1488_v31, 5  ;;  %v4069_v10 = vld [vmem:[%s5218_s0 + $0x108] ss:$8 sps:$4 sm:$0xff]   ;;  %v1550_v24 = vshll.u32 %v3247_v16, 16 }
  0x5b   :  { %3822 = vmatpush3.bf16.msra.mxu0 %v4058_v1  ;;  %3806 = vmatmul.mubr.bf16.gmra.mxu1 %v4057_v55  ;;  %v722_v1 = vrot.slane %v721_v63, 4  ;;  %v1505_v51 = vor.u32 %v1504_v44, %v1501_v43  ;;  %v3242_v55 = vld [vmem:[%s5218_s0 + $0xb0] sm:$0xf]  ;;  %v1522_v63 = vshll.u32 %v3243_v56, 16  ;;  %v4074_v44 = vld [vmem:[%s5218_s0 + $0x1f8] ss:$8 sps:$4 sm:$0xff]  }
  0x5c   :  { %3854 = vmatpush3.bf16.msra.mxu1 %v4059_v6  ;;  %3823 = vmatprep.subr.bf16.mxu0 %v4060_v23  ;;  %v3236_v6 = vld [vmem:[%s5218_s0 + $0x98] sm:$0xf]  ;;  %v1491_v49 = vor.u32 %v1490_v40, %v1487_v39  ;;  %v1513_v60 = vshrl.u32 %v3242_v55, 16  ;;  %v1516_v61 = vshll.u32 %v3242_v55, 16 }
  0x5d   :  { %3855 = vmatprep.subr.bf16.mxu1 %v4061_v28  ;;  %3773 = vmatprep.mubr.bf16.mxu0 %v3128_v62  ;;  %v727_v7 = vsel %vm4374_vm2, %v722_v1, %v726_v59  ;;  %v1471_v14 = vshrl.u32 %v3236_v6, 16  ;;  %v1474_v15 = vshll.u32 %v3236_v6, 16  ;;  %v1506_v54 = vrot.slane %v1505_v51, 4  ;;  %v3245_v59 = vld [vmem:[%s5218_s0 + $0xbc] sm:$0x1] }
  0x5e   :  { %v3129_v13 = vcombine.low %v713_v3, %v727_v7  ;;  %v1492_v52 = vrot.slane %v1491_v49, 4  ;;  %v4067_v3 = vld [vmem:[%s5219_s1 + $0x1f0] sm:$0xff]   ;;  %v1515_v4 = vrot.slane %v1513_v60, 4  ;;  %v1518_v5 = vrot.slane %v1516_v61, 5  ;;  %v3253_v51 = vld [vmem:[%s5218_s0 + $0x1bc] sm:$0x1] }
  0x5f   :  { %3824 = vmatpush3.bf16.msra.mxu0 %v4060_v23  ;;  %v1473_v20 = vrot.slane %v1471_v14, 4  ;;  %v1476_v21 = vrot.slane %v1474_v15, 5  ;;  %v1463_v23 = vor.u32 %v1462_v18, %v1459_v17  ;;  %v1511_v62 = vsel %vm4374_vm2, %v1506_v54, %v1510_v45  ;;  %v3246_v15 = vld [vmem:[%s5218_s0 + $0xc0] sm:$0xf]  ;;  %v4071_v17 = vld [vmem:[%s5219_s1 + $0x1e8] sm:$0xff]  }
  0x60   :  { %3856 = vmatpush3.bf16.msra.mxu1 %v4061_v28  ;;  %3873 = vmatprep.subr.bf16.mxu0 %v4531_v33  ;;  %v4063_v28 = vld [vmem:[%s5218_s0 + $0xe8] ss:$8 sps:$4 sm:$0xff]   ;;  %v1497_v58 = vsel %vm4374_vm2, %v1492_v52, %v1496_v41  ;;  %v1536_v6 = vshll.u32 %v3245_v59, 16  ;;  %v1519_v12 = vor.u32 %v1518_v5, %v1515_v4  ;;  %v3251_v49 = vld [vmem:[%s5218_s0 + $0x1b4] sm:$0x1]  ;;  %v4077_v59 = vld [vmem:[%s5219_s1 + $0x1d8] sm:$0xff]  }
  0x61   :  { %3905 = vmatprep.subr.bf16.mxu1 %v4551_v46  ;;  %3774 = vmatmul.mubr.bf16.gmra.mxu0 %v3129_v13  ;;  %v1477_v27 = vor.u32 %v1476_v21, %v1473_v20  ;;  %v1464_v34 = vrot.slane %v1463_v23, 4  ;;  %v1524_v13 = vrot.slane %v1522_v63, 5  ;;  %v3249_v20 = vld [vmem:[%s5218_s0 + $0xcc] sm:$0x1]  ;;  %v1541_v21 = vshrl.u32 %v3246_v15, 16  ;;  %v4079_v5 = vld [vmem:[%s5219_s1 + $0x1d0] sm:$0xff]  }
  0x62   :  { %3825 = vmatprep.mubr.bf16.mxu0 %v4062_v2  ;;  %v3283_v2 = vcombine.low %v1497_v58, %v1511_v62  ;;  %v1538_v14 = vrot.slane %v1536_v6, 5  ;;  %v1520_v23 = vrot.slane %v1519_v12, 4  ;;  %v1564_v29 = vshll.u32 %v3249_v20, 16  ;;  %v3250_v45 = vld [vmem:[%s5218_s0 + $0x1b0] sm:$0xf]  ;;  %v4082_v63 = vld [vmem:[%s5219_s1 + $0x188] sm:$0xff]  }
  0x63   :  { %v1478_v38 = vrot.slane %v1477_v27, 4  ;;  %v1469_v42 = vsel %vm4374_vm2, %v1464_v34, %v1468_v19  ;;  %v3248_v19 = vld [vmem:[%s5218_s0 + $0xc8] sm:$0xf]  ;;  %v4073_v34 = vld [vmem:[%s5219_s1 + $0x1e0] sm:$0xff]   ;;  %v1572_v54 = vshll.u32 %v3250_v45, 16  ;;  %v1578_v55 = vshll.u32 %v3251_v49, 16 }
  0x64   :  { %v1555_v25 = vshrl.u32 %v3248_v19, 16  ;;  %v1558_v26 = vshll.u32 %v3248_v19, 16  ;;  %v1525_v30 = vsel %vm4374_vm2, %v1520_v23, %v1524_v13  ;;  %v1566_v39 = vrot.slane %v1564_v29, 5  ;;  %v4075_v62 = vld [vmem:[%s5218_s0 + $0x208] ss:$8 sps:$4 sm:$0xff]  }
  0x65   :  { %v1483_v48 = vsel %vm4374_vm2, %v1478_v38, %v1482_v22  ;;  %v1544_v22 = vshll.u32 %v3246_v15, 16  ;;  %v1552_v38 = vrot.slane %v1550_v24, 5  ;;  %v1574_v61 = vrot.slane %v1572_v54, 5  ;;  %v3254_v4 = vld [vmem:[%s5218_s0 + $0x1c0] sm:$0xf] }
  0x66   :  { %v3282_v50 = vcombine.low %v1469_v42, %v1483_v48  ;;  %v1557_v31 = vrot.slane %v1555_v25, 4  ;;  %v1560_v32 = vrot.slane %v1558_v26, 5  ;;  %v1597_v12 = vshrl.u32 %v3254_v4, 16  ;;  %v4084_v15 = vld [vmem:[%s5219_s1 + $0x180] sm:$0xff]  }
  0x67   :  { %v1600_v13 = vshll.u32 %v3254_v4, 16 }
  0x68   :  { %3857 = vmatprep.mubr.bf16.mxu1 %v3282_v50  ;;  %v1561_v41 = vor.u32 %v1560_v32, %v1557_v31  ;;  %v3252_v50 = vld [vmem:[%s5218_s0 + $0x1b8] sm:$0xf] }
  0x69   :  { %3826 = vmatmul.mubr.bf16.vlgmr.msra.gmra.mxu0 %v4063_v28  ;;  %3858 = vmatmul.mubr.bf16.vlgmr.msra.gmra.mxu1 %v3283_v2  ;;  %v1543_v28 = vrot.slane %v1541_v21, 4  ;;  %v1586_v58 = vshll.u32 %v3252_v50, 16  ;;  %v1599_v21 = vrot.slane %v1597_v12, 4 }
  0x6a   :  { %3874 = vmatpush3.bf16.msra.mxu0 %v4531_v33  ;;  %3829 = vmatprep.mubr.bf16.mxu0 %v4068_v53  ;;  %v3244_v33 = vld [vmem:[%s5218_s0 + $0xb8] sm:$0xf]  ;;  %v1562_v43 = vrot.slane %v1561_v41, 4  ;;  %v1569_v53 = vshrl.u32 %v3250_v45, 16 }
  0x6b   :  { %3875 = vmatprep.subr.bf16.mxu0 %v4066_v47  ;;  %v1527_v0 = vshrl.u32 %v3244_v33, 16  ;;  %v1530_v1 = vshll.u32 %v3244_v33, 16  ;;  %3906 = vmatpush3.bf16.msra.mxu1 %v4551_v46  ;;  %v1546_v46 = vrot.slane %v1544_v22, 5  ;;  %v1592_v33 = vshll.u32 %v3253_v51, 16 }
  0x6c   :  { %3907 = vmatprep.subr.bf16.mxu1 %v4067_v3  ;;  %v1567_v52 = vsel %vm4374_vm2, %v1562_v43, %v1566_v39  ;;  %v1571_v60 = vrot.slane %v1569_v53, 4  ;;  %v1588_v2 = vrot.slane %v1586_v58, 5  ;;  %v1602_v22 = vrot.slane %v1600_v13, 5  ;;  %v3260_v39 = vld [vmem:[%s5218_s0 + $0x1d8] sm:$0xf] }
  0x6d   :  { %v1529_v7 = vrot.slane %v1527_v0, 4  ;;  %v1532_v9 = vrot.slane %v1530_v1, 5  ;;  %v1547_v37 = vor.u32 %v1546_v46, %v1543_v28  ;;  %v1580_v0 = vrot.slane %v1578_v55, 5  ;;  %v4083_v28 = vld [vmem:[%s5219_s1 + $0x1c8] sm:$0xff]  }
  0x6e   :  { %3876 = vmatpush3.bf16.msra.mxu0 %v4066_v47  ;;  %v4078_v47 = vld [vmem:[%s5219_s1 + $0x190] sm:$0xff]   ;;  %v1575_v6 = vor.u32 %v1574_v61, %v1571_v60  ;;  %v1603_v29 = vor.u32 %v1602_v22, %v1599_v21  ;;  %v1639_v45 = vshrl.u32 %v3260_v39, 16  ;;  %v3263_v60 = vld [vmem:[%s5218_s0 + $0x1e4] sm:$0x1]  ;;  %v3264_v61 = vld [vmem:[%s5218_s0 + $0x1e8] sm:$0xf] }
  0x6f   :  { %3877 = vmatprep.subr.bf16.mxu0 %v4070_v57  ;;  %v1533_v18 = vor.u32 %v1532_v9, %v1529_v7  ;;  %3908 = vmatpush3.bf16.msra.mxu1 %v4067_v3  ;;  %v1548_v42 = vrot.slane %v1547_v37, 4  ;;  %v1594_v3 = vrot.slane %v1592_v33, 5  ;;  %v3255_v7 = vld [vmem:[%s5218_s0 + $0x1c4] sm:$0x1]  ;;  %v3256_v9 = vld [vmem:[%s5218_s0 + $0x1c8] sm:$0xf] }
  0x70   :  { %3909 = vmatprep.subr.bf16.mxu1 %v4071_v17  ;;  %v1576_v16 = vrot.slane %v1575_v6, 4  ;;  %v1604_v32 = vrot.slane %v1603_v29, 4  ;;  %v1641_v55 = vrot.slane %v1639_v45, 4  ;;  %v4081_v58 = vld [vmem:[%s5218_s0 + $0x228] ss:$8 sps:$4 sm:$0xff]   ;;  %v1667_v4 = vshrl.u32 %v3264_v61, 16 }
  0x71   :  { %3830 = vmatmul.mubr.bf16.gmra.mxu0 %v4069_v10  ;;  %v1534_v27 = vrot.slane %v1533_v18, 4  ;;  %v1553_v48 = vsel %vm4374_vm2, %v1548_v42, %v1552_v38  ;;  %v3257_v10 = vld [vmem:[%s5218_s0 + $0x1cc] sm:$0x1]  ;;  %v1614_v18 = vshll.u32 %v3256_v9, 16  ;;  %v3259_v38 = vld [vmem:[%s5218_s0 + $0x1d4] sm:$0x1] }
  0x72   :  { %3878 = vmatpush3.bf16.msra.mxu0 %v4070_v57  ;;  %3833 = vmatprep.mubr.bf16.mxu0 %v4074_v44  ;;  %v3285_v56 = vcombine.low %v1553_v48, %v1567_v52  ;;  %v1583_v57 = vshrl.u32 %v3252_v50, 16  ;;  %v1620_v19 = vshll.u32 %v3257_v10, 16  ;;  %v1581_v24 = vsel %vm4374_vm2, %v1576_v16, %v1580_v0  ;;  %v3261_v42 = vld [vmem:[%s5218_s0 + $0x1dc] sm:$0x1]  ;;  %v3262_v33 = vld [vmem:[%s5218_s0 + $0x1e0] sm:$0xf] }
  0x73   :  { %3879 = vmatprep.subr.bf16.mxu0 %v4072_v11  ;;  %v1539_v36 = vsel %vm4374_vm2, %v1534_v27, %v1538_v14  ;;  %3910 = vmatpush3.bf16.msra.mxu1 %v4071_v17  ;;  %v1606_v14 = vshll.u32 %v3255_v7, 16  ;;  %v1611_v17 = vshrl.u32 %v3256_v9, 16  ;;  %v1616_v26 = vrot.slane %v1614_v18, 5  ;;  %v4086_v21 = vld [vmem:[%s5218_s0 + $0x8] ss:$8 sps:$4 sm:$0xff]  }
  0x74   :  { %v3284_v40 = vcombine.low %v1525_v30, %v1539_v36  ;;  %3911 = vmatprep.subr.bf16.mxu1 %v4073_v34  ;;  %v1585_v1 = vrot.slane %v1583_v57, 4  ;;  %v1622_v27 = vrot.slane %v1620_v19, 5  ;;  %v4726_v36 = vld [vmem:[%s5219_s1 + $0x238] sm:$0xff]   ;;  %v1634_v44 = vshll.u32 %v3259_v38, 16  ;;  %v4092_v29 = vld [vmem:[%s5218_s0 + $0x28] ss:$8 sps:$4 sm:$0xff]  }
  0x75   :  { %v1608_v23 = vrot.slane %v1606_v14, 5  ;;  %v1613_v25 = vrot.slane %v1611_v17, 4  ;;  %v1642_v50 = vshll.u32 %v3260_v39, 16  ;;  %v1648_v51 = vshll.u32 %v3261_v42, 16  ;;  %v4100_v38 = vld [vmem:[%s5218_s0 + $0x138] ss:$8 sps:$4 sm:$0xff]  }
  0x76   :  { %3880 = vmatpush3.bf16.msra.mxu0 %v4072_v11  ;;  %3861 = vmatprep.mubr.bf16.mxu1 %v3284_v40  ;;  %v1589_v11 = vor.u32 %v1588_v2, %v1585_v1  ;;  %v1636_v54 = vrot.slane %v1634_v44, 5  ;;  %v1653_v0 = vshrl.u32 %v3262_v33, 16  ;;  %v1656_v1 = vshll.u32 %v3262_v33, 16  ;;  %v4815_v39 = vld [vmem:[%s5219_s1 + $0x210] sm:$0xff]   ;;  %v4830_v42 = vld [vmem:[%s5219_s1 + $0x208] sm:$0xff]  }
  0x77   :  { %3881 = vmatprep.subr.bf16.mxu0 %v4076_v35  ;;  %3862 = vmatmul.mubr.bf16.gmra.mxu1 %v3285_v56  ;;  %v1617_v31 = vor.u32 %v1616_v26, %v1613_v25  ;;  %v1609_v41 = vsel %vm4374_vm2, %v1604_v32, %v1608_v23  ;;  %v1644_v56 = vrot.slane %v1642_v50, 5  ;;  %v1650_v57 = vrot.slane %v1648_v51, 5  ;;  %v4091_v23 = vld [vmem:[%s5219_s1 + $0x230] sm:$0xff]   ;;  %v4088_v25 = vld [vmem:[%s5218_s0 + $0x18] ss:$8 sps:$4 sm:$0xff]  }
  0x78   :  { %3912 = vmatpush3.bf16.msra.mxu1 %v4073_v34  ;;  %v1590_v20 = vrot.slane %v1589_v11, 4  ;;  %v4080_v34 = vld [vmem:[%s5218_s0 + $0x218] ss:$8 sps:$4 sm:$0xff]   ;;  %v1662_v2 = vshll.u32 %v3263_v60, 16  ;;  %v1655_v9 = vrot.slane %v1653_v0, 4  ;;  %v1658_v10 = vrot.slane %v1656_v1, 5 }
  0x79   :  { %3834 = vmatmul.mubr.bf16.gmra.mxu0 %v4075_v62  ;;  %3913 = vmatprep.subr.bf16.mxu1 %v4077_v59  ;;  %v1618_v37 = vrot.slane %v1617_v31, 4  ;;  %v3265_v62 = vld [vmem:[%s5218_s0 + $0x1ec] sm:$0x1]  ;;  %v1669_v13 = vrot.slane %v1667_v4, 4  ;;  %v4094_v31 = vld [vmem:[%s5218_s0 + $0x38] ss:$8 sps:$4 sm:$0xff]  }
  0x7a   :  { %3882 = vmatpush3.bf16.msra.mxu0 %v4076_v35  ;;  %v1595_v46 = vsel %vm4374_vm2, %v1590_v20, %v1594_v3  ;;  %v3258_v35 = vld [vmem:[%s5218_s0 + $0x1d0] sm:$0xf]  ;;  %3837 = vmatprep.mubr.bf16.mxu0 %v4080_v34  ;;  %v1676_v6 = vshll.u32 %v3265_v62, 16  ;;  %v1664_v11 = vrot.slane %v1662_v2, 5  ;;  %v1659_v17 = vor.u32 %v1658_v10, %v1655_v9  ;;  %v4097_v32 = vld [vmem:[%s5219_s1 + $0x220] sm:$0xff]  }
  0x7b   :  { %3883 = vmatprep.subr.bf16.mxu0 %v4078_v47  ;;  %v3286_v30 = vcombine.low %v1581_v24, %v1595_v46  ;;  %v1625_v40 = vshrl.u32 %v3258_v35, 16  ;;  %v1628_v43 = vshll.u32 %v3258_v35, 16  ;;  %v1623_v48 = vsel %vm4374_vm2, %v1618_v37, %v1622_v27  ;;  %v4087_v27 = vld [vmem:[%s5218_s0 + $0x50] ss:$8 sps:$4 sm:$0xff]   ;;  %v4096_v46 = vld [vmem:[%s5219_s1 + $0x228] sm:$0xff]   ;;  %v4872_v2 = vld [vmem:[%s5219_s1 + $0x200] sm:$0xff]  }
  0x7c   :  { %3914 = vmatpush3.bf16.msra.mxu1 %v4077_v59  ;;  %v3287_v52 = vcombine.low %v1609_v41, %v1623_v48  ;;  %v1660_v20 = vrot.slane %v1659_v17, 4  ;;  %v4093_v34 = vld [vmem:[%s5218_s0 + $0x70] ss:$8 sps:$4 sm:$0xff]   ;;  %v3395_v44 = vld [vmem:[%s5218_s0 + $0xc] sm:$0x1] }
  0x7d   :  { %3915 = vmatprep.subr.bf16.mxu1 %v4079_v5  ;;  %3865 = vmatprep.mubr.bf16.mxu1 %v3286_v30  ;;  %v1627_v49 = vrot.slane %v1625_v40, 4  ;;  %v1630_v53 = vrot.slane %v1628_v43, 5  ;;  %v4089_v30 = vld [vmem:[%s5218_s0 + $0x60] ss:$8 sps:$4 sm:$0xff]   ;;  %v4806_v37 = vld [vmem:[%s5219_s1 + $0x218] sm:$0xff]   ;;  %v2418_v51 = vshll.u32 %v3395_v44, 16 }
  0x7e   :  { %3884 = vmatpush3.bf16.msra.mxu0 %v4078_v47  ;;  %v4085_v47 = vld [vmem:[%s5219_s1 + $0x1c0] sm:$0xff]   ;;  %v1665_v24 = vsel %vm4374_vm2, %v1660_v20, %v1664_v11  ;;  %v4098_v35 = vld [vmem:[%s5218_s0 + $0x128] ss:$8 sps:$4 sm:$0xff]   ;;  %v3397_v48 = vld [vmem:[%s5218_s0 + $0x14] sm:$0x1] }
  0x7f   :  { %3885 = vmatprep.subr.bf16.mxu0 %v4082_v63  ;;  %3866 = vmatmul.mubr.bf16.gmra.mxu1 %v3287_v52  ;;  %v1631_v59 = vor.u32 %v1630_v53, %v1627_v49  ;;  %v4104_v40 = vld [vmem:[%s5218_s0 + $0x148] ss:$8 sps:$4 sm:$0xff]   ;;  %v4106_v45 = vld [vmem:[%s5218_s0 + $0x158] ss:$8 sps:$4 sm:$0xff]   ;;  %v3411_v33 = vld [vmem:[%s5218_s0 + $0x12c] sm:$0x1] }
  0x80   :  { %3916 = vmatpush3.bf16.msra.mxu1 %v4079_v5  ;;  %v1670_v5 = vshll.u32 %v3264_v61, 16  ;;  %v4099_v41 = vld [vmem:[%s5218_s0 + $0x170] ss:$8 sps:$4 sm:$0xff]   ;;  %v3394_v43 = vld [vmem:[%s5218_s0 + $0x8] sm:$0xf]  ;;  %v2420_v61 = vrot.slane %v2418_v51, 5 }
  0x81   :  { %3917 = vmatprep.subr.bf16.mxu1 %v4083_v28  ;;  %3838 = vmatmul.mubr.bf16.gmra.mxu0 %v4081_v58  ;;  %v1632_v3 = vrot.slane %v1631_v59, 4  ;;  %v2409_v49 = vshrl.u32 %v3394_v43, 16  ;;  %v2412_v50 = vshll.u32 %v3394_v43, 16  ;;  %v3412_v59 = vld [vmem:[%s5218_s0 + $0x130] sm:$0xf] }
  0x82   :  { %3886 = vmatpush3.bf16.msra.mxu0 %v4082_v63  ;;  %v1645_v63 = vor.u32 %v1644_v56, %v1641_v55  ;;  %v1672_v14 = vrot.slane %v1670_v5, 5  ;;  %3889 = vmatprep.mubr.bf16.mxu0 %v4086_v21  ;;  %v3410_v55 = vld [vmem:[%s5218_s0 + $0x128] sm:$0xf]  ;;  %v4105_v60 = vld [vmem:[%s5218_s0 + $0x190] ss:$8 sps:$4 sm:$0xff]   ;;  %v2535_v10 = vshrl.u32 %v3412_v59, 16 }
  0x83   :  { %3887 = vmatprep.subr.bf16.mxu0 %v4084_v15  ;;  %v1637_v12 = vsel %vm4374_vm2, %v1632_v3, %v1636_v54  ;;  %v2432_v54 = vshll.u32 %v3397_v48, 16  ;;  %v4101_v56 = vld [vmem:[%s5218_s0 + $0x180] ss:$8 sps:$4 sm:$0xff]   ;;  %v2414_v58 = vrot.slane %v2412_v50, 5  ;;  %v3413_v1 = vld [vmem:[%s5218_s0 + $0x134] sm:$0x1] }
  0x84   :  { %3918 = vmatpush3.bf16.msra.mxu1 %v4083_v28  ;;  %v1646_v7 = vrot.slane %v1645_v63, 4  ;;  %v1673_v19 = vor.u32 %v1672_v14, %v1669_v13  ;;  %v2521_v4 = vshrl.u32 %v3410_v55, 16  ;;  %v2524_v5 = vshll.u32 %v3410_v55, 16  ;;  %v3399_v13 = vld [vmem:[%s5218_s0 + $0x1c] sm:$0x1] }
  0x85   :  { %3919 = vmatprep.subr.bf16.mxu1 %v4085_v47  ;;  %v2434_v0 = vrot.slane %v2432_v54, 5  ;;  %v2538_v11 = vshll.u32 %v3412_v59, 16  ;;  %v2537_v20 = vrot.slane %v2535_v10, 4  ;;  %v3417_v50 = vld [vmem:[%s5218_s0 + $0x144] sm:$0x1] }
  0x86   :  { %3888 = vmatpush3.bf16.msra.mxu0 %v4084_v15  ;;  %v1678_v15 = vrot.slane %v1676_v6, 5  ;;  %v1651_v16 = vsel %vm4374_vm2, %v1646_v7, %v1650_v57  ;;  %v1674_v22 = vrot.slane %v1673_v19, 4  ;;  %v2411_v57 = vrot.slane %v2409_v49, 4  ;;  %v3398_v7 = vld [vmem:[%s5218_s0 + $0x18] sm:$0xf] }
  0x87   :  { %3937 = vmatprep.subr.bf16.mxu0 %v4726_v36  ;;  %v3288_v18 = vcombine.low %v1637_v12, %v1651_v16  ;;  %v2530_v6 = vshll.u32 %v3411_v33, 16  ;;  %v2544_v12 = vshll.u32 %v3413_v1, 16  ;;  %v2526_v16 = vrot.slane %v2524_v5, 5  ;;  %v3416_v49 = vld [vmem:[%s5218_s0 + $0x140] sm:$0xf] }
  0x88   :  { %3920 = vmatpush3.bf16.msra.mxu1 %v4085_v47  ;;  %v1679_v26 = vsel %vm4374_vm2, %v1674_v22, %v1678_v15  ;;  %v3396_v47 = vld [vmem:[%s5218_s0 + $0x10] sm:$0xf]  ;;  %v2415_v3 = vor.u32 %v2414_v58, %v2411_v57  ;;  %v2523_v15 = vrot.slane %v2521_v4, 4  ;;  %v2540_v21 = vrot.slane %v2538_v11, 5 }
  0x89   :  { %3969 = vmatprep.subr.bf16.mxu1 %v4726_v36  ;;  %3869 = vmatprep.mubr.bf16.mxu1 %v3288_v18  ;;  %v3289_v28 = vcombine.low %v1665_v24, %v1679_v26  ;;  %v2423_v52 = vshrl.u32 %v3396_v47, 16  ;;  %v2426_v53 = vshll.u32 %v3396_v47, 16  ;;  %v2532_v17 = vrot.slane %v2530_v6, 5  ;;  %v3400_v18 = vld [vmem:[%s5218_s0 + $0x20] sm:$0xf] }
  0x8a   :  { %3890 = vmatmul.mubr.bf16.vlgmr.msra.gmra.mxu0 %v4088_v25  ;;  %v2416_v14 = vrot.slane %v2415_v3, 4  ;;  %v2546_v22 = vrot.slane %v2544_v12, 5  ;;  %v2527_v24 = vor.u32 %v2526_v16, %v2523_v15  ;;  %v2437_v25 = vshrl.u32 %v3398_v7, 16  ;;  %v3404_v4 = vld [vmem:[%s5218_s0 + $0x30] sm:$0xf] }
  0x8b   :  { %3938 = vmatpush3.bf16.msra.mxu0 %v4726_v36  ;;  %3870 = vmatmul.mubr.bf16.gmra.mxu1 %v3289_v28  ;;  %v2425_v62 = vrot.slane %v2423_v52, 4  ;;  %v2428_v63 = vrot.slane %v2426_v53, 5  ;;  %v2440_v26 = vshll.u32 %v3398_v7, 16  ;;  %v2541_v28 = vor.u32 %v2540_v21, %v2537_v20 }
  0x8c   :  { %3939 = vmatprep.subr.bf16.mxu0 %v4091_v23  ;;  %3921 = vmatprep.mubr.bf16.mxu1 %v4087_v27  ;;  %v2454_v44 = vshll.u32 %v3400_v18, 16  ;;  %v2566_v1 = vshll.u32 %v3416_v49, 16  ;;  %v2572_v3 = vshll.u32 %v3417_v50, 16 }
  0x8d   :  { %3893 = vmatprep.mubr.bf16.mxu0 %v4092_v29  ;;  %v2429_v9 = vor.u32 %v2428_v63, %v2425_v62  ;;  %v2446_v29 = vshll.u32 %v3399_v13, 16  ;;  %v3403_v63 = vld [vmem:[%s5218_s0 + $0x2c] sm:$0x1]  ;;  %v3405_v13 = vld [vmem:[%s5218_s0 + $0x34] sm:$0x1] }
  0x8e   :  { %v2456_v53 = vrot.slane %v2454_v44, 5  ;;  %v2568_v11 = vrot.slane %v2566_v1, 5  ;;  %v2574_v12 = vrot.slane %v2572_v3, 5  ;;  %v2474_v15 = vshll.u32 %v3403_v63, 16 }
  0x8f   :  { %3940 = vmatpush3.bf16.msra.mxu0 %v4091_v23  ;;  %v2430_v19 = vrot.slane %v2429_v9, 4 }
  0x90   :  { %3941 = vmatprep.subr.bf16.mxu0 %v4096_v46 }
  0x91   :  { %v2435_v27 = vsel %vm4374_vm2, %v2430_v19, %v2434_v0  ;;  %v3418_v19 = vld [vmem:[%s5218_s0 + $0x148] sm:$0xf] }
  0x92   :  { %3894 = vmatmul.mubr.bf16.gmra.mxu0 %v4094_v31  ;;  %v3414_v31 = vld [vmem:[%s5218_s0 + $0x138] sm:$0xf] }
  0x93   :  { %3942 = vmatpush3.bf16.msra.mxu0 %v4096_v46  ;;  %3897 = vmatprep.mubr.bf16.mxu0 %v4098_v35  ;;  %v2439_v35 = vrot.slane %v2437_v25, 4  ;;  %v2549_v51 = vshrl.u32 %v3414_v31, 16  ;;  %v2552_v54 = vshll.u32 %v3414_v31, 16  ;;  %v3420_v25 = vld [vmem:[%s5218_s0 + $0x150] sm:$0xf] }
  0x94   :  { %3922 = vmatmul.mubr.bf16.vlgmr.msra.gmra.mxu1 %v4089_v30  ;;  %3943 = vmatprep.subr.bf16.mxu0 %v4097_v32  ;;  %v2451_v30 = vshrl.u32 %v3400_v18, 16  ;;  %v2479_v18 = vshrl.u32 %v3404_v4, 16 }
  0x95   :  { %3977 = vmatpush3.bf16.msra.mxu1 %v4726_v36  ;;  %3925 = vmatprep.mubr.bf16.mxu1 %v4093_v34  ;;  %v4095_v36 = vld [vmem:[%s5218_s0 + $0x80] ss:$8 sps:$4 sm:$0xff]   ;;  %v2528_v34 = vrot.slane %v2527_v24, 4  ;;  %v2551_v59 = vrot.slane %v2549_v51, 4  ;;  %v3419_v24 = vld [vmem:[%s5218_s0 + $0x14c] sm:$0x1] }
  0x96   :  { %3970 = vmatprep.subr.bf16.mxu1 %v4091_v23  ;;  %v2453_v43 = vrot.slane %v2451_v30, 4 }
  0x97   :  { %3944 = vmatpush3.bf16.msra.mxu0 %v4097_v32 }
  0x98   :  { %3945 = vmatprep.subr.bf16.mxu0 %v4806_v37 }
  0x99   :  { %3978 = vmatpush3.bf16.msra.mxu1 %v4091_v23  ;;  %v2421_v23 = vsel %vm4374_vm2, %v2416_v14, %v2420_v61  ;;  %v2554_v61 = vrot.slane %v2552_v54, 5 }
  0x9a   :  { %3971 = vmatprep.subr.bf16.mxu1 %v4096_v46  ;;  %3898 = vmatmul.mubr.bf16.gmra.mxu0 %v4100_v38  ;;  %v3415_v38 = vld [vmem:[%s5218_s0 + $0x13c] sm:$0x1] }
  0x9b   :  { %3946 = vmatpush3.bf16.msra.mxu0 %v4806_v37  ;;  %3901 = vmatprep.mubr.bf16.mxu0 %v4104_v40  ;;  %v4107_v40 = vld [vmem:[%s5218_s0 + $0x1a0] ss:$8 sps:$4 sm:$0xff]   ;;  %v2558_v55 = vshll.u32 %v3415_v38, 16  ;;  %v2555_v7 = vor.u32 %v2554_v61, %v2551_v59  ;;  %v2586_v38 = vshll.u32 %v3419_v24, 16 }
  0x9c   :  { %3926 = vmatmul.mubr.bf16.gmra.mxu1 %v4095_v36  ;;  %3947 = vmatprep.subr.bf16.mxu0 %v4815_v39  ;;  %v2542_v36 = vrot.slane %v2541_v28, 4  ;;  %v2481_v28 = vrot.slane %v2479_v18, 4 }
  0x9d   :  { %3979 = vmatpush3.bf16.msra.mxu1 %v4096_v46  ;;  %3929 = vmatprep.mubr.bf16.mxu1 %v4099_v41  ;;  %v3401_v46 = vld [vmem:[%s5218_s0 + $0x24] sm:$0x1]  ;;  %v2448_v41 = vrot.slane %v2446_v29, 5  ;;  %v2560_v62 = vrot.slane %v2558_v55, 5  ;;  %v3421_v29 = vld [vmem:[%s5218_s0 + $0x154] sm:$0x1] }
  0x9e   :  { %3972 = vmatprep.subr.bf16.mxu1 %v4097_v32  ;;  %v2460_v48 = vshll.u32 %v3401_v46, 16  ;;  %v2547_v52 = vsel %vm4374_vm2, %v2542_v36, %v2546_v22  ;;  %v2476_v22 = vrot.slane %v2474_v15, 5  ;;  %v2488_v46 = vshll.u32 %v3405_v13, 16 }
  0x9f   :  { %3948 = vmatpush3.bf16.msra.mxu0 %v4815_v39 }
  0xa0   :  { %3949 = vmatprep.subr.bf16.mxu0 %v4830_v42  ;;  %v2462_v33 = vrot.slane %v2460_v48, 5 }
  0xa1   :  { %3980 = vmatpush3.bf16.msra.mxu1 %v4097_v32  ;;  %v3442_v32 = vcombine.low %v2421_v23, %v2435_v27  ;;  %v2482_v23 = vshll.u32 %v3404_v4, 16 }
  0xa2   :  { %3973 = vmatprep.subr.bf16.mxu1 %v4806_v37  ;;  %3902 = vmatmul.mubr.bf16.gmra.mxu0 %v4106_v45  ;;  %v2533_v45 = vsel %vm4374_vm2, %v2528_v34, %v2532_v17  ;;  %v2556_v17 = vrot.slane %v2555_v7, 4  ;;  %v2580_v34 = vshll.u32 %v3418_v19, 16 }
  0xa3   :  { %3950 = vmatpush3.bf16.msra.mxu0 %v4830_v42  ;;  %3953 = vmatprep.mubr.bf16.mxu0 %v3442_v32  ;;  %v3446_v57 = vcombine.low %v2533_v45, %v2547_v52  ;;  %v2484_v31 = vrot.slane %v2482_v23, 5  ;;  %v2577_v32 = vshrl.u32 %v3418_v19, 16 }
  0xa4   :  { %3930 = vmatmul.mubr.bf16.gmra.mxu1 %v4101_v56  ;;  %3951 = vmatprep.subr.bf16.mxu0 %v4872_v2  ;;  %v3402_v56 = vld [vmem:[%s5218_s0 + $0x28] sm:$0xf] }
  0xa5   :  { %3981 = vmatpush3.bf16.msra.mxu1 %v4806_v37  ;;  %3933 = vmatprep.mubr.bf16.mxu1 %v4105_v60  ;;  %v2442_v37 = vrot.slane %v2440_v26, 5  ;;  %v2457_v60 = vor.u32 %v2456_v53, %v2453_v43  ;;  %v2465_v5 = vshrl.u32 %v3402_v56, 16  ;;  %v2468_v10 = vshll.u32 %v3402_v56, 16 }
  0xa6   :  { %3974 = vmatprep.subr.bf16.mxu1 %v4815_v39  ;;  %v2561_v26 = vsel %vm4374_vm2, %v2556_v17, %v2560_v62 }
  0xa7   :  { %3952 = vmatpush3.bf16.msra.mxu0 %v4872_v2  ;;  %v2443_v47 = vor.u32 %v2442_v37, %v2439_v35  ;;  %v2458_v6 = vrot.slane %v2457_v60, 4  ;;  %v2467_v14 = vrot.slane %v2465_v5, 4  ;;  %v3406_v35 = vld [vmem:[%s5218_s0 + $0x38] sm:$0xf]  ;;  %v2490_v37 = vrot.slane %v2488_v46, 5 }
  0xa9   :  { %3982 = vmatpush3.bf16.msra.mxu1 %v4815_v39  ;;  %v2444_v58 = vrot.slane %v2443_v47, 4  ;;  %v2563_v39 = vshrl.u32 %v3416_v49, 16  ;;  %v2463_v16 = vsel %vm4374_vm2, %v2458_v6, %v2462_v33 }
  0xaa   :  { %3975 = vmatprep.subr.bf16.mxu1 %v4830_v42 }
  0xab   :  { %v2449_v0 = vsel %vm4374_vm2, %v2444_v58, %v2448_v41  ;;  %v2565_v9 = vrot.slane %v2563_v39, 4 }
  0xac   :  { %3934 = vmatmul.mubr.bf16.gmra.mxu1 %v4107_v40  ;;  %v3443_v20 = vcombine.low %v2449_v0, %v2463_v16  ;;  %v2591_v40 = vshrl.u32 %v3420_v25, 16 }
  0xad   :  { %3983 = vmatpush3.bf16.msra.mxu1 %v4830_v42  ;;  %3961 = vmatprep.mubr.bf16.mxu1 %v3446_v57  ;;  %v2470_v42 = vrot.slane %v2468_v10, 5  ;;  %v2569_v21 = vor.u32 %v2568_v11, %v2565_v9 }
  0xae   :  { %3976 = vmatprep.subr.bf16.mxu1 %v4872_v2  ;;  %3954 = vmatmul.mubr.bf16.vlgmr.msra.gmra.mxu0 %v3443_v20 }
  0xaf   :  { %v2471_v27 = vor.u32 %v2470_v42, %v2467_v14  ;;  %v2570_v30 = vrot.slane %v2569_v21, 4 }
  0xb1   :  { %3984 = vmatpush3.bf16.msra.mxu1 %v4872_v2  ;;  %v2472_v2 = vrot.slane %v2471_v27, 4 }
  0xb2   :  { %11 = vsyncpa [#allocation5], 0  ;;  %v2575_v36 = vsel %vm4374_vm2, %v2570_v30, %v2574_v12  ;;  %v2485_v41 = vor.u32 %v2484_v31, %v2481_v28  ;;  %v2579_v43 = vrot.slane %v2577_v32, 4  ;;  %v2582_v44 = vrot.slane %v2580_v34, 5  ;;  %v3407_v45 = vld [vmem:[%s5218_s0 + $0x3c] sm:$0x1] }
  0xb3   :  { %v3408_v47 = vld [vmem:[%s5218_s0 + $0x40] sm:$0xf]  ;;  %v3447_v48 = vcombine.low %v2561_v26, %v2575_v36  ;;  %v2477_v49 = vsel %vm4374_vm2, %v2472_v2, %v2476_v22  ;;  %v2593_v50 = vrot.slane %v2591_v40, 4  ;;  %v2594_v53 = vshll.u32 %v3420_v25, 16  ;;  %v3409_v55 = vld [vmem:[%s5218_s0 + $0x44] sm:$0x1] }
  0xb4   :  { %v2486_v51 = vrot.slane %v2485_v41, 4  ;;  %v2583_v52 = vor.u32 %v2582_v44, %v2579_v43  ;;  %v2600_v54 = vshll.u32 %v3421_v29, 16  ;;  %v2493_v56 = vshrl.u32 %v3406_v35, 16  ;;  %v3422_v39 = vld [vmem:[%s5218_s0 + $0x158] sm:$0xf] }
  0xb5   :  { %3962 = vmatmul.mubr.bf16.vlgmr.msra.gmra.mxu1 %v3447_v48  ;;  %v2496_v57 = vshll.u32 %v3406_v35, 16  ;;  %v2502_v58 = vshll.u32 %v3407_v45, 16  ;;  %v2507_v33 = vshrl.u32 %v3408_v47, 16  ;;  %v2588_v61 = vrot.slane %v2586_v38, 5  ;;  %v3424_v4 = vld [vmem:[%s5218_s0 + $0x160] sm:$0xf] }
  0xb6   :  { %v2491_v59 = vsel %vm4374_vm2, %v2486_v51, %v2490_v37  ;;  %v2584_v60 = vrot.slane %v2583_v52, 4  ;;  %v2596_v62 = vrot.slane %v2594_v53, 5  ;;  %v2602_v0 = vrot.slane %v2600_v54, 5  ;;  %v3423_v10 = vld [vmem:[%s5218_s0 + $0x15c] sm:$0x1] }
  0xb7   :  { %v3444_v63 = vcombine.low %v2477_v49, %v2491_v59  ;;  %v2495_v1 = vrot.slane %v2493_v56, 4  ;;  %v2498_v3 = vrot.slane %v2496_v57, 5  ;;  %v2504_v6 = vrot.slane %v2502_v58, 5  ;;  %v3425_v19 = vld [vmem:[%s5218_s0 + $0x164] sm:$0x1]  ;;  %s4174_s0 = smov [#allocation2]  }
  0xb8   :  { %v2597_v5 = vor.u32 %v2596_v62, %v2593_v50  ;;  %v2509_v7 = vrot.slane %v2507_v33, 4  ;;  %v2510_v9 = vshll.u32 %v3408_v47, 16  ;;  %v2516_v12 = vshll.u32 %v3409_v55, 16  ;;  %s3004_s29 = sshll.u32 %s4174_s0, 4  ;;  %s3005_s29 = int_to_ptr.vmem [resolvable:$true] %s3004_s29 }
  0xb9   :  { %3957 = vmatprep.mubr.bf16.mxu0 %v3444_v63  ;;  %v2499_v11 = vor.u32 %v2498_v3, %v2495_v1  ;;  %v2605_v13 = vshrl.u32 %v3422_v39, 16  ;;  %v2608_v14 = vshll.u32 %v3422_v39, 16  ;;  %v2589_v15 = vsel %vm4374_vm2, %v2584_v60, %v2588_v61  ;;  %s4110_s30 = scalar_lea.vmem %s3005_s29, 1024  ;;  %p4115_p1 = scmp.lt.s32.totalorder %s3005_s29, %s3005_s29 }
  0xba   :  { %v2598_v16 = vrot.slane %v2597_v5, 4  ;;  %v2512_v17 = vrot.slane %v2510_v9, 5  ;;  %v2619_v42 = vshrl.u32 %v3424_v4, 16  ;;  %v2614_v22 = vshll.u32 %v3423_v10, 16  ;;  %p4111_p0 = scmp.ne.s32.totalorder %s3005_s29, %s4110_s30  ;;  %p4116_p2 = scmp.lt.s32.totalorder %s4110_s30, %s4110_s30 }
  0xbb   :  { %v2500_v18 = vrot.slane %v2499_v11, 4  ;;  %v2607_v20 = vrot.slane %v2605_v13, 4  ;;  %v2610_v21 = vrot.slane %v2608_v14, 5  ;;  %v2518_v25 = vrot.slane %v2516_v12, 5 }
  0xbc   :  { %v2603_v23 = vsel %vm4374_vm2, %v2598_v16, %v2602_v0  ;;  %v2513_v24 = vor.u32 %v2512_v17, %v2509_v7  ;;  %v2621_v28 = vrot.slane %v2619_v42, 4  ;;  %v2622_v46 = vshll.u32 %v3424_v4, 16  ;;  %p4117_p3 = por %p4116_p2, %p4115_p1 }
  0xbd   :  { %v3448_v26 = vcombine.low %v2589_v15, %v2603_v23  ;;  %v2611_v27 = vor.u32 %v2610_v21, %v2607_v20  ;;  %v2505_v29 = vsel %vm4374_vm2, %v2500_v18, %v2504_v6  ;;  %v2628_v31 = vshll.u32 %v3425_v19, 16 }
  0xbe   :  { %v2514_v30 = vrot.slane %v2513_v24, 4  ;;  %v2616_v34 = vrot.slane %v2614_v22, 5  ;;  %v2624_v35 = vrot.slane %v2622_v46, 5  ;;  %p4118_p4 = pnand %p4117_p3, %p4111_p0 }
  0xbf   :  { %3965 = vmatprep.mubr.bf16.mxu1 %v3448_v26  ;;  %v2612_v32 = vrot.slane %v2611_v27, 4  ;;  %v2630_v40 = vrot.slane %v2628_v31, 5 }
  0xc0   :  { %v2519_v2 = vsel %vm4374_vm2, %v2514_v30, %v2518_v25  ;;  %v2625_v38 = vor.u32 %v2624_v35, %v2621_v28 }
  0xc1   :  { %v3445_v37 = vcombine.low %v2505_v29, %v2519_v2  ;;  %v2617_v36 = vsel %vm4374_vm2, %v2612_v32, %v2616_v34 }
  0xc2   :  { %v2626_v41 = vrot.slane %v2625_v38, 4 }
  0xc3   :  { %3958 = vmatmul.mubr.bf16.gmra.mxu0 %v3445_v37 }
  0xc4   :  { %v2631_v43 = vsel %vm4374_vm2, %v2626_v41, %v2630_v40 }
  0xc5   :  { %v3449_v44 = vcombine.low %v2617_v36, %v2631_v43 }
  0xc7   :  { %3966 = vmatmul.mubr.bf16.gmra.mxu1 %v3449_v44 }
  0xe2   :  { %v3699_v45 = vpop.f32.mrf.mxu0 }
  0xe3   :  { %v3731_v47 = vpop.f32.mrf.mxu1 }
  0xe4   :  { %v415_v48 = vadd.f32 %v3731_v47, %v3699_v45  ;;  %v213_v49 = vpop.f32.mrf.mxu0 }
  0xe5   :  { %v406_v50 = vpop.f32.mrf.mxu1 }
  0xe6   :  { %v407_v51 = vadd.f32 %v406_v50, %v213_v49  ;;  %v3700_v52 = vpop.f32.mrf.mxu0 }
  0xe7   :  { %v3732_v53 = vpop.f32.mrf.mxu1 }
  0xe8   :  { %v418_v54 = vadd.f32 %v3732_v53, %v3700_v52  ;;  %v216_v55 = vpop.f32.mrf.mxu0 }
  0xe9   :  { %v409_v56 = vpop.f32.mrf.mxu1 }
  0xea   :  { %v410_v57 = vadd.f32 %v409_v56, %v216_v55  ;;  %v3703_v58 = vpop.f32.mrf.mxu0 }
  0xeb   :  { %v3735_v33 = vpop.f32.mrf.mxu1 }
  0xec   :  { %v431_v59 = vadd.f32 %v3735_v33, %v3703_v58  ;;  %v229_v60 = vpop.f32.mrf.mxu0 }
  0xed   :  { %v422_v8 = vpop.f32.mrf.mxu1 }
  0xee   :  { %v423_v61 = vadd.f32 %v422_v8, %v229_v60  ;;  %v3704_v62 = vpop.f32.mrf.mxu0 }
  0xef   :  { %v3736_v39 = vpop.f32.mrf.mxu1 }
  0xf0   :  { %v434_v63 = vadd.f32 %v3736_v39, %v3704_v62  ;;  %v232_v0 = vpop.f32.mrf.mxu0 }
  0xf1   :  { %v425_v1 = vpop.f32.mrf.mxu1 }
  0xf2   :  { %v426_v3 = vadd.f32 %v425_v1, %v232_v0  ;;  %v3707_v4 = vpop.f32.mrf.mxu0 }
  0xf3   :  { %v3739_v5 = vpop.f32.mrf.mxu1 }
  0xf4   :  { %v447_v6 = vadd.f32 %v3739_v5, %v3707_v4  ;;  %v245_v7 = vpop.f32.mrf.mxu0 }
  0xf5   :  { %v438_v9 = vpop.f32.mrf.mxu1 }
  0xf6   :  { %v439_v10 = vadd.f32 %v438_v9, %v245_v7  ;;  %v3708_v11 = vpop.f32.mrf.mxu0 }
  0xf7   :  { %v3740_v12 = vpop.f32.mrf.mxu1 }
  0xf8   :  { %v450_v13 = vadd.f32 %v3740_v12, %v3708_v11  ;;  %v248_v14 = vpop.f32.mrf.mxu0 }
  0xf9   :  { %v441_v15 = vpop.f32.mrf.mxu1 }
  0xfa   :  { %v442_v16 = vadd.f32 %v441_v15, %v248_v14  ;;  %v3711_v17 = vpop.f32.mrf.mxu0 }
  0xfb   :  { %v3743_v42 = vpop.f32.mrf.mxu1 }
  0xfc   :  { %v463_v18 = vadd.f32 %v3743_v42, %v3711_v17  ;;  %v261_v19 = vpop.f32.mrf.mxu0 }
  0xfd   :  { %v454_v20 = vpop.f32.mrf.mxu1 }
  0xfe   :  { %v455_v21 = vadd.f32 %v454_v20, %v261_v19  ;;  %v3712_v22 = vpop.f32.mrf.mxu0 }
  0xff   :  { %v3744_v23 = vpop.f32.mrf.mxu1 }
 0x100   :  { %v466_v24 = vadd.f32 %v3744_v23, %v3712_v22  ;;  %v264_v25 = vpop.f32.mrf.mxu0 }
 0x101   :  { %v457_v26 = vpop.f32.mrf.mxu1 }
 0x102   :  { %v458_v27 = vadd.f32 %v457_v26, %v264_v25  ;;  %v3763_v28 = vpop.f32.mrf.mxu0 }
 0x103   :  { %v924_v46 = vadd.f32 %v3763_v28, %v415_v48  ;;  %v3795_v29 = vpop.f32.mrf.mxu1 }
 0x104   :  { %v859_v30 = vpop.f32.mrf.mxu0 }
 0x105   :  { %v4992_v31 = vadd.f32 %v3795_v29, %v924_v46  ;;  %v922_v32 = vadd.f32 %v859_v30, %v407_v51  ;;  %v1102_v34 = vpop.f32.mrf.mxu1 }
 0x106   :  { %v3764_v35 = vpop.f32.mrf.mxu0 }
 0x107   :  { %v4994_v2 = vadd.f32 %v1102_v34, %v922_v32  ;;  %v925_v37 = vadd.f32 %v3764_v35, %v418_v54  ;;  %v3796_v38 = vpop.f32.mrf.mxu1 }
 0x108   :  { %v862_v40 = vpop.f32.mrf.mxu0 }
 0x109   :  { %v4996_v36 = vadd.f32 %v3796_v38, %v925_v37  ;;  %v923_v41 = vadd.f32 %v862_v40, %v410_v57  ;;  %v1105_v43 = vpop.f32.mrf.mxu1 }
 0x10a   :  { %v3767_v48 = vpop.f32.mrf.mxu0 }
 0x10b   :  { %v4998_v44 = vadd.f32 %v1105_v43, %v923_v41  ;;  %v3799_v45 = vpop.f32.mrf.mxu1  ;;  %v928_v50 = vadd.f32 %v3767_v48, %v431_v59 }
 0x10c   :  { %v875_v52 = vpop.f32.mrf.mxu0 }
 0x10d   :  { %v1118_v47 = vpop.f32.mrf.mxu1  ;;  %v1171_v51 = vadd.f32 %v3799_v45, %v928_v50  ;;  %v926_v53 = vadd.f32 %v875_v52, %v423_v61 }
 0x10e   :  { %v3768_v56 = vpop.f32.mrf.mxu0 }
 0x10f   :  { %v3800_v49 = vpop.f32.mrf.mxu1  ;;  %v1169_v58 = vadd.f32 %v1118_v47, %v926_v53  ;;  %v929_v54 = vadd.f32 %v3768_v56, %v434_v63 }
 0x110   :  { %v878_v33 = vpop.f32.mrf.mxu0 }
 0x111   :  { %v1121_v55 = vpop.f32.mrf.mxu1  ;;  %v1172_v60 = vadd.f32 %v3800_v49, %v929_v54  ;;  %v927_v8 = vadd.f32 %v878_v33, %v426_v3 }
 0x113   :  { %v3803_v62 = vpop.f32.mrf.mxu1  ;;  %v1170_v57 = vadd.f32 %v1121_v55, %v927_v8 }
 0x115   :  { %v1134_v39 = vpop.f32.mrf.mxu1 }
 0x116   :  { %v3771_v0 = vpop.f32.mrf.mxu0 }
 0x117   :  { %v932_v1 = vadd.f32 %v3771_v0, %v447_v6  ;;  %v3804_v4 = vpop.f32.mrf.mxu1 }
 0x118   :  { %v891_v5 = vpop.f32.mrf.mxu0 }
 0x119   :  { %v5000_v7 = vadd.f32 %v3803_v62, %v932_v1  ;;  %v930_v59 = vadd.f32 %v891_v5, %v439_v10  ;;  %v1137_v12 = vpop.f32.mrf.mxu1 }
 0x11a   :  { %v3772_v9 = vpop.f32.mrf.mxu0 }
 0x11b   :  { %v5002_v11 = vadd.f32 %v1134_v39, %v930_v59  ;;  %v933_v61 = vadd.f32 %v3772_v9, %v450_v13  ;;  %v3807_v17 = vpop.f32.mrf.mxu1 }
 0x11c   :  { %v894_v14 = vpop.f32.mrf.mxu0 }
 0x11d   :  { %v5004_v63 = vadd.f32 %v3804_v4, %v933_v61  ;;  %v931_v15 = vadd.f32 %v894_v14, %v442_v16  ;;  %v1150_v19 = vpop.f32.mrf.mxu1 }
 0x11f   :  { %v5006_v3 = vadd.f32 %v1137_v12, %v931_v15  ;;  %v3808_v25 = vpop.f32.mrf.mxu1 }
 0x121   :  { %v3775_v42 = vpop.f32.mrf.mxu0  ;;  %v1153_v16 = vpop.f32.mrf.mxu1 }
 0x122   :  { %v936_v6 = vadd.f32 %v3775_v42, %v463_v18 }
 0x123   :  { %v907_v20 = vpop.f32.mrf.mxu0 }
 0x124   :  { %v5008_v22 = vadd.f32 %v3807_v17, %v936_v6  ;;  %v934_v23 = vadd.f32 %v907_v20, %v455_v21 }
 0x125   :  { %v3776_v10 = vpop.f32.mrf.mxu0 }
 0x126   :  { %v5010_v26 = vadd.f32 %v1150_v19, %v934_v23  ;;  %v937_v13 = vadd.f32 %v3776_v10, %v466_v24 }
 0x127   :  { %v910_v28 = vpop.f32.mrf.mxu0 }
 0x128   :  { %v5012_v46 = vadd.f32 %v3808_v25, %v937_v13  ;;  %v935_v29 = vadd.f32 %v910_v28, %v458_v27 }
 0x129   :  { %v5014_v30 = vpop.f32.mrf.mxu0  ;;  %v5022_v35 = vpop.f32.mrf.mxu1 }
 0x12a   :  { %v5016_v32 = vadd.f32 %v1153_v16, %v935_v29 }
 0x12b   :  { %v5018_v34 = vpop.f32.mrf.mxu0  ;;  %v5026_v37 = vpop.f32.mrf.mxu1 }
 0x12d   :  { %v5020_v18 = vpop.f32.mrf.mxu0  ;;  %v5028_v41 = vpop.f32.mrf.mxu1 }
 0x12f   :  { %v5024_v21 = vpop.f32.mrf.mxu0  ;;  %v5030_v48 = vpop.f32.mrf.mxu1 }
 0x131   :  { %v3831_v24 = vpop.f32.mrf.mxu0 }
 0x132   :  { %v1414_v38 = vadd.f32 %v3831_v24, %v1171_v51 }
 0x133   :  { %v1361_v40 = vpop.f32.mrf.mxu0 }
 0x134   :  { %v1412_v27 = vadd.f32 %v1361_v40, %v1169_v58 }
 0x135   :  { %v3832_v43 = vpop.f32.mrf.mxu0 }
 0x136   :  { %v1415_v45 = vadd.f32 %v3832_v43, %v1172_v60 }
 0x137   :  { %v1364_v47 = vpop.f32.mrf.mxu0  ;;  %v3863_v50 = vpop.f32.mrf.mxu1 }
 0x138   :  { %v1413_v49 = vadd.f32 %v1364_v47, %v1170_v57  ;;  %v5032_v52 = vadd.f32 %v3863_v50, %v1414_v38 }
 0x139   :  { %v3835_v53 = vpop.f32.mrf.mxu0  ;;  %v1827_v55 = vpop.f32.mrf.mxu1 }
 0x13a   :  { %v5034_v56 = vadd.f32 %v1827_v55, %v1412_v27 }
 0x13b   :  { %v1377_v54 = vpop.f32.mrf.mxu0  ;;  %v3864_v33 = vpop.f32.mrf.mxu1 }
 0x13c   :  { %v5036_v51 = vadd.f32 %v3864_v33, %v1415_v45 }
 0x13d   :  { %v1830_v8 = vpop.f32.mrf.mxu1  ;;  %v3836_v58 = vpop.f32.mrf.mxu0 }
 0x13e   :  { %v5038_v62 = vadd.f32 %v1830_v8, %v1413_v49 }
 0x13f   :  { %v1380_v60 = vpop.f32.mrf.mxu0  ;;  %v3867_v39 = vpop.f32.mrf.mxu1 }
 0x140   :  { %5225 = vst [vmem:[#allocation9_spill] sm:$0xff] %v5038_v62 }
 0x141   :  { %v5040_v0 = vpop.f32.mrf.mxu0  ;;  %v5042_v57 = vpop.f32.mrf.mxu1 }
 0x143   :  { %v5044_v1 = vpop.f32.mrf.mxu0  ;;  %v3868_v4 = vpop.f32.mrf.mxu1 }
 0x145   :  { %v5046_v5 = vpop.f32.mrf.mxu0  ;;  %v1846_v9 = vpop.f32.mrf.mxu1 }
 0x147   :  { %v5048_v59 = vpop.f32.mrf.mxu0 }
 0x14a   :  { %v3891_v61 = vpop.f32.mrf.mxu0 }
 0x14b   :  { %v5050_v12 = vpop.f32.mrf.mxu1 }
 0x14c   :  { %5226 = vst [vmem:[#allocation10_spill] sm:$0xff] %v5050_v12  ;;  %v2054_v14 = vpop.f32.mrf.mxu0  ;;  %v1411_v12 = vadd.f32 %v5020_v18, %v4996_v36  ;;  %v1419_v36 = vadd.f32 %v3836_v58, %v5004_v63 }
 0x14d   :  { %v5052_v15 = vpop.f32.mrf.mxu1 }
 0x14e   :  { %5227 = vst [vmem:[#allocation11_spill] sm:$0xff] %v5052_v15  ;;  %v3892_v17 = vpop.f32.mrf.mxu0  ;;  %v1877_v62 = vadd.f32 %v5028_v41, %v1411_v12 }
 0x14f   :  { %v5054_v42 = vpop.f32.mrf.mxu1 }
 0x150   :  { %5228 = vst [vmem:[#allocation12_spill] sm:$0xff] %v5054_v42  ;;  %v2057_v19 = vpop.f32.mrf.mxu0 }
 0x151   :  { %v5056_v6 = vpop.f32.mrf.mxu1 }
 0x152   :  { %5229 = vst [vmem:[#allocation13_spill] sm:$0xff] %v5056_v6  ;;  %v5058_v20 = vpop.f32.mrf.mxu0 }
 0x154   :  { %v3923_v23 = vpop.f32.mrf.mxu1  ;;  %v5060_v10 = vpop.f32.mrf.mxu0 }
 0x156   :  { %v2297_v25 = vpop.f32.mrf.mxu1  ;;  %v5062_v13 = vpop.f32.mrf.mxu0 }
 0x158   :  { %v3924_v28 = vpop.f32.mrf.mxu1  ;;  %v5064_v29 = vpop.f32.mrf.mxu0 }
 0x159   :  { %5230 = vst [vmem:[#allocation14_spill] sm:$0xff] %v5064_v29 }
 0x15a   :  { %v2300_v16 = vpop.f32.mrf.mxu1  ;;  %v3899_v24 = vpop.f32.mrf.mxu0 }
 0x15c   :  { %v5066_v38 = vpop.f32.mrf.mxu1  ;;  %v2086_v40 = vpop.f32.mrf.mxu0 }
 0x15d   :  { %5231 = vst [vmem:[#allocation15_spill] sm:$0xff] %v5066_v38  ;;  %v1410_v38 = vadd.f32 %v5014_v30, %v4992_v31  ;;  %v1418_v31 = vadd.f32 %v3835_v53, %v5000_v7  ;;  %v1885_v53 = vadd.f32 %v3868_v4, %v1419_v36 }
 0x15e   :  { %v5068_v27 = vpop.f32.mrf.mxu1  ;;  %v3900_v43 = vpop.f32.mrf.mxu0 }
 0x15f   :  { %v1884_v7 = vadd.f32 %v3867_v39, %v1418_v31 }
 0x160   :  { %v5070_v45 = vpop.f32.mrf.mxu1  ;;  %v2089_v47 = vpop.f32.mrf.mxu0 }
 0x161   :  { %5232 = vst [vmem:[#allocation16_spill] sm:$0xff] %v5070_v45 }
 0x162   :  { %v5072_v49 = vpop.f32.mrf.mxu1  ;;  %v5074_v50 = vpop.f32.mrf.mxu0 }
 0x163   :  { %5233 = vst [vmem:[#allocation17_spill] sm:$0xff] %v5072_v49  ;;  %5234 = vst [vmem:[#allocation18_spill] sm:$0xff] %v5074_v50  ;;  %v1408_v49 = vadd.f32 %v5018_v34, %v4994_v2  ;;  %v1409_v50 = vadd.f32 %v5024_v21, %v4998_v44  ;;  %v2120_v44 = vadd.f32 %v3892_v17, %v1877_v62 }
 0x164   :  { %v3931_v55 = vpop.f32.mrf.mxu1  ;;  %v5076_v8 = vpop.f32.mrf.mxu0  ;;  %v1416_v21 = vadd.f32 %v1377_v54, %v5002_v11 }
 0x165   :  { %5235 = vst [vmem:[#allocation19_spill] sm:$0xff] %v5076_v8  ;;  %v1874_v18 = vadd.f32 %v5026_v37, %v1408_v49  ;;  %v1875_v2 = vadd.f32 %v5030_v48, %v1409_v50  ;;  %v2363_v12 = vadd.f32 %v3924_v28, %v2120_v44  ;;  %v2127_v48 = vadd.f32 %v3899_v24, %v1884_v7  ;;  %v5241_v7 = vld [vmem:[#allocation10_spill] sm:$0xff] }
 0x166   :  { %v2329_v33 = vpop.f32.mrf.mxu1  ;;  %v5078_v42 = vpop.f32.mrf.mxu0  ;;  %v1882_v37 = vadd.f32 %v5042_v57, %v1416_v21  ;;  %v2124_v44 = vadd.f32 %v5062_v13, %v5036_v51  ;;  %v1420_v21 = vadd.f32 %v5044_v1, %v5010_v26  ;;  %v5245_v26 = vld [vmem:[#allocation11_spill] sm:$0xff] }
 0x167   :  { %5236 = vst [vmem:[#allocation20_spill] sm:$0xff] %v5078_v42  ;;  %v1876_v42 = vadd.f32 %v5022_v35, %v1410_v38  ;;  %v2117_v35 = vadd.f32 %v2054_v14, %v1874_v18  ;;  %v2118_v38 = vadd.f32 %v2057_v19, %v1875_v2  ;;  %v1422_v18 = vadd.f32 %v5040_v0, %v5008_v22  ;;  %v5240_v22 = vld [vmem:[#allocation14_spill] sm:$0xff] }
 0x168   :  { %v3932_v6 = vpop.f32.mrf.mxu1  ;;  %v5092_v8 = vpop.f32.mrf.mxu0  ;;  %v2125_v14 = vadd.f32 %v2086_v40, %v1882_v37  ;;  %v1423_v2 = vadd.f32 %v5046_v5, %v5012_v46  ;;  %v5242_v5 = vld [vmem:[#allocation12_spill] sm:$0xff]  ;;  %v1886_v1 = vadd.f32 %v5245_v26, %v1420_v21 }
 0x169   :  { %v2119_v34 = vadd.f32 %v3891_v61, %v1876_v42  ;;  %v2128_v61 = vadd.f32 %v3900_v43, %v1885_v53  ;;  %v2360_v17 = vadd.f32 %v2297_v25, %v2117_v35  ;;  %v2361_v11 = vadd.f32 %v2300_v16, %v2118_v38  ;;  %v5239_v38 = vld [vmem:[#allocation9_spill] sm:$0xff]  ;;  %v5244_v51 = vld [vmem:[#allocation16_spill] sm:$0xff] }
 0x16a   :  { %v2332_v15 = vpop.f32.mrf.mxu1  ;;  %v2368_v24 = vadd.f32 %v2329_v33, %v2125_v14  ;;  %v2121_v33 = vadd.f32 %v5060_v10, %v5034_v56  ;;  %v1421_v35 = vadd.f32 %v5048_v59, %v5016_v32  ;;  %v2122_v0 = vadd.f32 %v5240_v22, %v5239_v38  ;;  %v5246_v32 = vld [vmem:[#allocation13_spill] sm:$0xff] }
 0x16b   :  { %v2362_v58 = vadd.f32 %v3923_v23, %v2119_v34  ;;  %v2370_v23 = vadd.f32 %v3931_v55, %v2127_v48  ;;  %v2371_v28 = vadd.f32 %v3932_v6, %v2128_v61  ;;  %v2123_v34 = vadd.f32 %v5058_v20, %v5032_v52  ;;  %v5243_v20 = vld [vmem:[#allocation15_spill] sm:$0xff]  ;;  %v5249_v61 = vld [vmem:[#allocation17_spill] sm:$0xff] }
 0x16c   :  { %v5084_v45 = vpop.f32.mrf.mxu1  ;;  %v2364_v10 = vadd.f32 %v5068_v27, %v2121_v33  ;;  %v1888_v46 = vadd.f32 %v5241_v7, %v1422_v18  ;;  %v1889_v53 = vadd.f32 %v5242_v5, %v1423_v2  ;;  %v2367_v13 = vadd.f32 %v5244_v51, %v2124_v44 }
 0x16d   :  { %5237 = vst [vmem:[#allocation21_spill] sm:$0xff] %v5084_v45  ;;  %v1887_v59 = vadd.f32 %v5246_v32, %v1421_v35 }
 0x16e   :  { %v5090_v29 = vpop.f32.mrf.mxu1  ;;  %v3955_v45 = vpop.f32.mrf.mxu0  ;;  %v5248_v37 = vld [vmem:[#allocation20_spill] sm:$0xff] }
 0x16f   :  { %5238 = vst [vmem:[#allocation22_spill] sm:$0xff] %v5090_v29  ;;  %v1417_v29 = vadd.f32 %v1380_v60, %v5006_v3  ;;  %v5107_v54 = vadd.f32 %v3955_v45, %v2362_v58 }
 0x170   :  { %v5098_v30 = vpop.f32.mrf.mxu1  ;;  %v2763_v63 = vpop.f32.mrf.mxu0 }
 0x171   :  { %v1883_v49 = vadd.f32 %v1846_v9, %v1417_v29  ;;  %v5111_v4 = vadd.f32 %v2763_v63, %v2360_v17  ;;  %v2366_v63 = vadd.f32 %v5243_v20, %v2123_v34 }
 0x172   :  { %v5104_v41 = vpop.f32.mrf.mxu1  ;;  %v3956_v62 = vpop.f32.mrf.mxu0 }
 0x173   :  { %v5109_v60 = vadd.f32 %v3956_v62, %v2363_v12  ;;  %v2126_v42 = vadd.f32 %v2089_v47, %v1883_v49  ;;  %v5247_v12 = vld [vmem:[#allocation18_spill] sm:$0xff]  ;;  %v2132_v49 = vadd.f32 %v5248_v37, %v1889_v53  ;;  %v2365_v62 = vadd.f32 %v5249_v61, %v2122_v0 }
 0x174   :  { %v2766_v39 = vpop.f32.mrf.mxu0  ;;  %v2131_v27 = vadd.f32 %v5247_v12, %v1888_v46 }
 0x175   :  { %v3963_v3 = vpop.f32.mrf.mxu1  ;;  %v3498_v57 = vpack.c.bf16 %v5109_v60, %v5107_v54  ;;  %v5115_v9 = vadd.f32 %v2766_v39, %v2361_v11  ;;  %v2369_v40 = vadd.f32 %v2332_v15, %v2126_v42  ;;  %v5250_v42 = vld [vmem:[#allocation19_spill] sm:$0xff] }
 0x176   :  { %v5121_v43 = vadd.f32 %v3963_v3, %v2370_v23  ;;  %v2129_v39 = vadd.f32 %v5250_v42, %v1886_v1 }
 0x177   :  { %v2795_v19 = vpop.f32.mrf.mxu1  ;;  %3530 = vst [vmem:[#allocation2 + $0x8] sm:$0xff] %v3498_v57   ;;  %v2842_v29 = vadd.f32 %v5115_v9, %v5111_v4  ;;  %v3493_v16 = vpack.c.bf16 %v5115_v9, %v5111_v4 }
 0x178   :  { %v5126_v55 = vadd.f32 %v2795_v19, %v2368_v24  ;;  %v2130_v19 = vadd.f32 %v5092_v8, %v1887_v59  ;;  %v2375_v24 = vadd.f32 %v5098_v30, %v2132_v49 }
 0x179   :  { %v3964_v25 = vpop.f32.mrf.mxu1  ;;  %v2843_v47 = vadd.f32 %v2842_v29, %v5107_v54  ;;  %3494 = vst [vmem:[#allocation2] sm:$0xff] %v3493_v16   ;;  %v5251_v29 = vld [vmem:[#allocation21_spill] sm:$0xff] }
 0x17a   :  { %v5123_v45 = vadd.f32 %v3964_v25, %v2371_v28  ;;  %v2374_v16 = vadd.f32 %v5251_v29, %v2131_v27 }
 0x17b   :  { %v2798_v50 = vpop.f32.mrf.mxu1  ;;  %v2844_v36 = vadd.f32 %v2843_v47, %v5109_v60 }
 0x17c   :  { %v3518_v6 = vpack.c.bf16 %v5123_v45, %v5121_v43  ;;  %v5130_v31 = vadd.f32 %v2798_v50, %v2369_v40 }
 0x17e   :  { %3534 = vst [vmem:[#allocation2 + $0x28] sm:$0xff] %v3518_v6   ;;  %v3513_v15 = vpack.c.bf16 %v5130_v31, %v5126_v55  ;;  %v5252_v6 = vld [vmem:[#allocation22_spill] sm:$0xff] }
 0x17f   :  { %v2372_v8 = vadd.f32 %v5252_v6, %v2129_v39 }
 0x180   :  { %3533 = vst [vmem:[#allocation2 + $0x20] sm:$0xff] %v3513_v15  }
 0x183   :  { %v3959_v56 = vpop.f32.mrf.mxu0 }
 0x184   :  { %v5163_v17 = vadd.f32 %v3959_v56, %v2366_v63 }
 0x185   :  { %v2779_v52 = vpop.f32.mrf.mxu0 }
 0x186   :  { %v5156_v58 = vadd.f32 %v2779_v52, %v2364_v10 }
 0x187   :  { %v3960_v48 = vpop.f32.mrf.mxu0  ;;  %v3967_v11 = vpop.f32.mrf.mxu1 }
 0x188   :  { %v2845_v3 = vadd.f32 %v2844_v36, %v5156_v58  ;;  %v5166_v14 = vadd.f32 %v3960_v48, %v2367_v13  ;;  %v2373_v36 = vadd.f32 %v5104_v41, %v2130_v19  ;;  %v5181_v15 = vadd.f32 %v3967_v11, %v2374_v16 }
 0x189   :  { %v2782_v57 = vpop.f32.mrf.mxu0  ;;  %v2811_v23 = vpop.f32.mrf.mxu1 }
 0x18a   :  { %v3508_v28 = vpack.c.bf16 %v5166_v14, %v5163_v17  ;;  %v5172_v25 = vadd.f32 %v2782_v57, %v2365_v62  ;;  %v2838_v2 = vadd.f32 %v2811_v23, %v2372_v8 }
 0x18b   :  { %v3968_v40 = vpop.f32.mrf.mxu1 }
 0x18c   :  { %3532 = vst [vmem:[#allocation2 + $0x18] sm:$0xff] %v3508_v28   ;;  %v2846_v47 = vadd.f32 %v2845_v3, %v5172_v25  ;;  %v3503_v50 = vpack.c.bf16 %v5172_v25, %v5156_v58  ;;  %v5183_v33 = vadd.f32 %v3968_v40, %v2375_v24 }
 0x18d   :  { %v2814_v30 = vpop.f32.mrf.mxu1 }
 0x18e   :  { %v2847_v18 = vadd.f32 %v2846_v47, %v5163_v17  ;;  %3531 = vst [vmem:[#allocation2 + $0x10] sm:$0xff] %v3503_v50   ;;  %v3528_v34 = vpack.c.bf16 %v5183_v33, %v5181_v15  ;;  %v2839_v44 = vadd.f32 %v2814_v30, %v2373_v36 }
 0x190   :  { %v2848_v21 = vadd.f32 %v2847_v18, %v5166_v14  ;;  %3536 = vst [vmem:[#allocation2 + $0x38] sm:$0xff] %v3528_v34   ;;  %v3523_v41 = vpack.c.bf16 %v2839_v44, %v2838_v2 }
 0x192   :  { %v2849_v35 = vadd.f32 %v2848_v21, %v5126_v55  ;;  %3535 = vst [vmem:[#allocation2 + $0x30] sm:$0xff] %v3523_v41  }
 0x194   :  { %v2850_v56 = vadd.f32 %v2849_v35, %v5130_v31 }
 0x195   :  { %4121 = shalt.err (!%p4118_p4)
}
 0x196   :  { %s4175_s5 = smov 64   ;;  %s4176_s6 = smov 4   ;;  %v2851_v10 = vadd.f32 %v2850_v56, %v5121_v43 }
 0x197   :  { %3010 = dma.vmem_to_hbm [thread:$0]  %s3005_s29, 1024, %s5220_s2, [#allocation3], %s4175_s5, %s4175_s5, %s4176_s6  }
 0x198   :  { %v2852_v38 = vadd.f32 %v2851_v10, %v5123_v45  ;;  %s4177_s9 = smov [#allocation4]  }
 0x199   :  { %s3017_s10 = sshll.u32 %s4177_s9, 4  ;;  %s3018_s10 = int_to_ptr.vmem [resolvable:$true] %s3017_s10 }
 0x19a   :  { %v2853_v22 = vadd.f32 %v2852_v38, %v2838_v2  ;;  %s4130_s2 = scalar_lea.vmem %s3018_s10, 16  ;;  %s4134_s1 = scalar_lea.vmem %s3018_s10, 32 }
 0x19b   :  { %p4131_p5 = scmp.ne.s32.totalorder %s3018_s10, %s4130_s2  ;;  %p4135_p6 = scmp.lt.s32.totalorder %s3018_s10, %s3018_s10 }
 0x19c   :  { %v2854_v0 = vadd.f32 %v2853_v22, %v2839_v44  ;;  %p4136_p7 = scmp.lt.s32.totalorder %s4134_s1, %s4130_s2 }
 0x19e   :  { %v2855_v7 = vadd.f32 %v2854_v0, %v5181_v15  ;;  %p4137_p8 = por %p4136_p7, %p4135_p6 }
 0x1a0   :  { %v2856_v46 = vadd.f32 %v2855_v7, %v5183_v33  ;;  %p4138_p9 = pnand %p4137_p8, %p4131_p5 }
 0x1a2   :  { %v2857_v5 = vrot.slane %v2856_v46, 4 }
 0x1a4   :  { %v2858_v53 = vadd.f32 %v2857_v5, %v2856_v46 }
 0x1a6   :  { %v2859_v52 = vrot.slane %v2858_v53, 2 }
 0x1a8   :  { %v2860_v20 = vadd.f32 %v2859_v52, %v2858_v53 }
 0x1aa   :  { %v2861_v63 = vrot.slane %v2860_v20, 1 }
 0x1ac   :  { %v2862_v51 = vadd.f32 %v2861_v63, %v2860_v20 }
 0x1ae   :  { %v2863_v13 = vmul.f32 0.0078125, %v2862_v51  ;;  %2997 = vst [vmem:[#allocation4] sm:$0x1] %v2862_v51 }
 0x1af   :  { %4141 = shalt.err (!%p4138_p9)
}
 0x1b0   :  { %3020 = dma.vmem_to_hbm [thread:$0]  %s3018_s10, 16, %s5221_s3, [#allocation5]   ;;  %v2864_v26 = vsub.f32 %v5111_v4, %v2863_v13  ;;  %v2865_v1 = vsub.f32 %v5115_v9, %v2863_v13  ;;  %v2866_v32 = vsub.f32 %v5107_v54, %v2863_v13  ;;  %v2867_v59 = vsub.f32 %v5109_v60, %v2863_v13 }
 0x1b1   :  { %v2868_v12 = vsub.f32 %v5156_v58, %v2863_v13  ;;  %v2869_v27 = vsub.f32 %v5172_v25, %v2863_v13  ;;  %v2870_v37 = vsub.f32 %v5163_v17, %v2863_v13  ;;  %v2871_v49 = vsub.f32 %v5166_v14, %v2863_v13  ;;  %s4178_s3 = smov [#allocation6]  }
 0x1b2   :  { %v2872_v48 = vsub.f32 %v5126_v55, %v2863_v13  ;;  %v2873_v61 = vsub.f32 %v5130_v31, %v2863_v13  ;;  %v2874_v4 = vsub.f32 %v5121_v43, %v2863_v13  ;;  %v2875_v9 = vsub.f32 %v5123_v45, %v2863_v13  ;;  %s3027_s13 = sshll.u32 %s4178_s3, 4  ;;  %s3028_s13 = int_to_ptr.vmem [resolvable:$true] %s3027_s13 }
 0x1b3   :  { %v2876_v62 = vsub.f32 %v2838_v2, %v2863_v13  ;;  %v2877_v54 = vsub.f32 %v2839_v44, %v2863_v13  ;;  %v2878_v60 = vsub.f32 %v5181_v15, %v2863_v13  ;;  %v2879_v58 = vsub.f32 %v5183_v33, %v2863_v13  ;;  %s4150_s14 = scalar_lea.vmem %s3028_s13, 16  ;;  %s4154_s15 = scalar_lea.vmem %s3028_s13, 32 }
 0x1b4   :  { %v2880_v11 = vmul.f32 %v2864_v26, %v2864_v26  ;;  %v2881_v3 = vmul.f32 %v2865_v1, %v2865_v1  ;;  %v2882_v42 = vmul.f32 %v2866_v32, %v2866_v32  ;;  %v2883_v39 = vmul.f32 %v2867_v59, %v2867_v59  ;;  %p4151_p10 = scmp.ne.s32.totalorder %s3028_s13, %s4150_s14  ;;  %p4155_p11 = scmp.lt.s32.totalorder %s3028_s13, %s3028_s13 }
 0x1b5   :  { %v2884_v19 = vmul.f32 %v2868_v12, %v2868_v12  ;;  %v2885_v57 = vmul.f32 %v2869_v27, %v2869_v27  ;;  %v2886_v23 = vmul.f32 %v2870_v37, %v2870_v37  ;;  %v2887_v28 = vmul.f32 %v2871_v49, %v2871_v49  ;;  %p4156_p12 = scmp.lt.s32.totalorder %s4154_s15, %s4150_s14 }
 0x1b6   :  { %v2896_v17 = vadd.f32 %v2881_v3, %v2880_v11  ;;  %v2888_v25 = vmul.f32 %v2872_v48, %v2872_v48  ;;  %v2889_v16 = vmul.f32 %v2873_v61, %v2873_v61  ;;  %v2890_v40 = vmul.f32 %v2874_v4, %v2874_v4 }
 0x1b7   :  { %v2891_v50 = vmul.f32 %v2875_v9, %v2875_v9  ;;  %v2892_v8 = vmul.f32 %v2876_v62, %v2876_v62  ;;  %v2893_v15 = vmul.f32 %v2877_v54, %v2877_v54  ;;  %v2894_v18 = vmul.f32 %v2878_v60, %v2878_v60  ;;  %p4157_p13 = por %p4156_p12, %p4155_p11 }
 0x1b8   :  { %v2897_v14 = vadd.f32 %v2896_v17, %v2882_v42  ;;  %v2895_v2 = vmul.f32 %v2879_v58, %v2879_v58 }
 0x1b9   :  { %p4158_p0 = pnand %p4157_p13, %p4151_p10 }
 0x1ba   :  { %v2898_v55 = vadd.f32 %v2897_v14, %v2883_v39 }
 0x1bc   :  { %v2899_v31 = vadd.f32 %v2898_v55, %v2884_v19 }
 0x1be   :  { %v2900_v43 = vadd.f32 %v2899_v31, %v2885_v57 }
 0x1c0   :  { %v2901_v45 = vadd.f32 %v2900_v43, %v2886_v23 }
 0x1c2   :  { %v2902_v29 = vadd.f32 %v2901_v45, %v2887_v28 }
 0x1c4   :  { %v2903_v24 = vadd.f32 %v2902_v29, %v2888_v25 }
 0x1c6   :  { %v2904_v47 = vadd.f32 %v2903_v24, %v2889_v16 }
 0x1c8   :  { %v2905_v6 = vadd.f32 %v2904_v47, %v2890_v40 }
 0x1ca   :  { %v2906_v36 = vadd.f32 %v2905_v6, %v2891_v50 }
 0x1cc   :  { %v2907_v33 = vadd.f32 %v2906_v36, %v2892_v8 }
 0x1ce   :  { %v2908_v30 = vadd.f32 %v2907_v33, %v2893_v15 }
 0x1d0   :  { %v2909_v34 = vadd.f32 %v2908_v30, %v2894_v18 }
 0x1d2   :  { %v2910_v44 = vadd.f32 %v2909_v34, %v2895_v2 }
 0x1d4   :  { %v2911_v21 = vrot.slane %v2910_v44, 4 }
 0x1d6   :  { %v2912_v41 = vadd.f32 %v2911_v21, %v2910_v44 }
 0x1d8   :  { %v2913_v35 = vrot.slane %v2912_v41, 2 }
 0x1da   :  { %v2914_v56 = vadd.f32 %v2913_v35, %v2912_v41 }
 0x1dc   :  { %v2915_v10 = vrot.slane %v2914_v56, 1 }
 0x1de   :  { %v2916_v38 = vadd.f32 %v2915_v10, %v2914_v56 }
 0x1e0   :  { %2998 = vst [vmem:[#allocation6] sm:$0x1] %v2916_v38 }
 0x1e1   :  { %4161 = shalt.err (!%p4158_p0)
}
 0x1e2   :  { %3030 = dma.vmem_to_hbm [thread:$0]  %s3028_s13, 16, %s5222_s4, [#allocation5]  }
 0x1e3   :  { %4170 = dma.done.wait [#allocation3], 1024  }
 0x1e4   :  { %4171 = vsyncadd [#allocation3], 4294966272 }
 0x1e5   :  { %4172 = dma.done.wait [#allocation5], 32  }
 0x1e6   :  { %4173 = vsyncadd [#allocation5], 4294967264 }
 0x1e7   :  { %3040 = vsyncpa [#allocation3], 1 }
 0x1e8   :  { %3041 = vsyncpa [#allocation5], 1 }

</bundles_post_ra>
